<compile_context>
chip_gen: v7x
topology: tpu7x:2x2x1
jax: 0.10.0
libtpu: 0.0.40
codegen_flags: <defaults>
</compile_context>

<pallas_src>
import jax
import jax.numpy as jnp
from jax.experimental import pallas as pl
from jax.experimental.pallas import tpu as pltpu

# ---------------- model dimensions (small, synthetic) ----------------
B = 2            # batch
C_IN = 3         # image channels
IMG = 16         # image resolution
PATCH = 8        # patch size  -> 2x2 = 4 patches
GRID = IMG // PATCH
NUM_PATCH = GRID * GRID
SEQ = NUM_PATCH + 1          # +1 class token
WIDTH = 32                   # transformer width
HEADS = 4
HEAD_DIM = WIDTH // HEADS
LAYERS = 2
OUT_DIM = 32                 # visual.output_dim
LN_EPS = 1e-5


# ---------------------------- fused Pallas kernel ----------------------------
def clip_visual_fused_kernel(
    patches_ref, patch_w_ref, cls_ref, pos_ref,
    ln_pre_g_ref, ln_pre_b_ref,
    ln1_g_ref, ln1_b_ref, attn_in_w_ref, attn_in_b_ref,
    attn_out_w_ref, attn_out_b_ref,
    ln2_g_ref, ln2_b_ref, fc_w_ref, fc_b_ref,
    mlp_w_ref, mlp_b_ref,
    ln_post_g_ref, ln_post_b_ref, proj_ref,
    out_ref,
):
    f32 = jnp.float32
    scale = HEAD_DIM ** -0.5

    def ln(t, g, b):
        m = jnp.mean(t, axis=-1, keepdims=True)
        v = jnp.mean((t - m) ** 2, axis=-1, keepdims=True)
        return (t - m) * jax.lax.rsqrt(v + LN_EPS) * g + b

    # ---- patch embedding: conv-as-matmul (CLIP conv1 has no bias) ----
    pe = jnp.dot(patches_ref[...], patch_w_ref[...],
                 preferred_element_type=f32)                 # [B*NUM_PATCH, WIDTH]

    # ---- prepend class token, add positional embedding ----
    cls_tok = cls_ref[...]                                   # [1, WIDTH]
    pos = pos_ref[...]                                       # [SEQ, WIDTH]
    rows = []
    for b in range(B):
        rows.append(cls_tok)
        rows.append(pe[b * NUM_PATCH:(b + 1) * NUM_PATCH, :])
    x = jnp.concatenate(rows, axis=0)                        # [B*SEQ, WIDTH]
    x = x + jnp.concatenate([pos] * B, axis=0)

    # ---- ln_pre ----
    x = ln(x, ln_pre_g_ref[...], ln_pre_b_ref[...])

    # ---- transformer layers (statically unrolled; activations stay on-chip) ----
    for l in range(LAYERS):
        # --- attention branch: x = x + attn_out(attn(ln_1(x))) ---
        h = ln(x, ln1_g_ref[l:l + 1, :], ln1_b_ref[l:l + 1, :])
        qkv = jnp.dot(h, attn_in_w_ref[l],
                      preferred_element_type=f32) + attn_in_b_ref[l:l + 1, :]   # [B*SEQ, 3W]

        batch_out = []
        for b in range(B):                    # static unroll: no grid-step overhead
            r0 = b * SEQ
            qb = qkv[r0:r0 + SEQ, 0 * WIDTH:1 * WIDTH]
            kb = qkv[r0:r0 + SEQ, 1 * WIDTH:2 * WIDTH]
            vb = qkv[r0:r0 + SEQ, 2 * WIDTH:3 * WIDTH]
            head_out = []
            for hh in range(HEADS):           # head split/merge stays in-kernel
                c0 = hh * HEAD_DIM
                qh = qb[:, c0:c0 + HEAD_DIM]
                kh = kb[:, c0:c0 + HEAD_DIM]
                vh = vb[:, c0:c0 + HEAD_DIM]
                s = jax.lax.dot_general(
                    qh, kh, (((1,), (1,)), ((), ())),
                    preferred_element_type=f32) * scale                  # [SEQ, SEQ]
                s = s - jnp.max(s, axis=-1, keepdims=True)
                p = jnp.exp(s)
                p = p / jnp.sum(p, axis=-1, keepdims=True)
                head_out.append(jnp.dot(p, vh, preferred_element_type=f32))  # [SEQ, dh]
            batch_out.append(jnp.concatenate(head_out, axis=-1))         # [SEQ, WIDTH]
        o = jnp.concatenate(batch_out, axis=0)                           # [B*SEQ, WIDTH]
        o = jnp.dot(o, attn_out_w_ref[l],
                    preferred_element_type=f32) + attn_out_b_ref[l:l + 1, :]
        x = x + o

        # --- MLP branch: x = x + proj(QuickGELU(fc(ln_2(x)))) ---
        h = ln(x, ln2_g_ref[l:l + 1, :], ln2_b_ref[l:l + 1, :])
        h = jnp.dot(h, fc_w_ref[l],
                    preferred_element_type=f32) + fc_b_ref[l:l + 1, :]
        h = h * jax.nn.sigmoid(1.702 * h)                    # QuickGELU
        h = jnp.dot(h, mlp_w_ref[l],
                    preferred_element_type=f32) + mlp_b_ref[l:l + 1, :]
        x = x + h

    # ---- fused tail: class token -> ln_post -> projection -> L2 normalize ----
    cls_rows = jnp.concatenate([x[b * SEQ:b * SEQ + 1, :] for b in range(B)],
                               axis=0)                                    # [B, WIDTH]
    cls_rows = ln(cls_rows, ln_post_g_ref[...], ln_post_b_ref[...])
    feats = jnp.dot(cls_rows, proj_ref[...], preferred_element_type=f32)  # [B, OUT_DIM]
    inv_norm = jax.lax.rsqrt(jnp.sum(feats * feats, axis=-1, keepdims=True))
    out_ref[...] = feats * inv_norm


# ---------------------------- model forward ----------------------------
def image_encoder_forward(params, pixel_values):
    """CLIP ViT visual tower. pixel_values: [B, C, H, W] (NCHW). One pallas_call."""
    Bn, C, H, W = pixel_values.shape
    gh, gw = H // PATCH, W // PATCH
    # patchify (glue): [B,C,gh,p,gw,p] -> [B,gh,gw,C,p,p] -> [B*patches, C*p*p]
    patches = pixel_values.reshape(Bn, C, gh, PATCH, gw, PATCH)
    patches = patches.transpose(0, 2, 4, 1, 3, 5).reshape(
        Bn * gh * gw, C * PATCH * PATCH)

    layers = params["layers"]

    def stack(name):
        return jnp.stack([lp[name] for lp in layers], axis=0)

    def row(v):
        return v.reshape(1, -1)

    args = (
        patches,
        params["patch_w"],
        row(params["class_emb"]),
        params["pos_emb"],
        row(params["ln_pre_g"]), row(params["ln_pre_b"]),
        stack("ln1_g"), stack("ln1_b"),
        stack("attn_in_w"), stack("attn_in_b"),
        stack("attn_out_w"), stack("attn_out_b"),
        stack("ln2_g"), stack("ln2_b"),
        stack("fc_w"), stack("fc_b"),
        stack("proj_w"), stack("proj_b"),
        row(params["ln_post_g"]), row(params["ln_post_b"]),
        params["proj"],
    )

    return pl.pallas_call(
        clip_visual_fused_kernel,
        out_shape=jax.ShapeDtypeStruct((Bn, OUT_DIM), jnp.float32),
        compiler_params=pltpu.CompilerParams(vmem_limit_bytes=32 * 1024 * 1024),
    )(*args)


def custom_clip_forward(params, input_ids, attention_mask, pixel_values):
    # input_ids / attention_mask are unused in the reference forward().
    del input_ids, attention_mask
    # L2 normalization is fused inside the kernel tail.
    return image_encoder_forward(params, pixel_values.astype(jnp.float32))


# ---------------------------- pure-JAX reference ----------------------------
def ref_forward(params, pixel_values):
    Bn, C, H, W = pixel_values.shape
    gh, gw = H // PATCH, W // PATCH
    x = pixel_values.reshape(Bn, C, gh, PATCH, gw, PATCH)
    x = x.transpose(0, 2, 4, 1, 3, 5).reshape(Bn, gh * gw, C * PATCH * PATCH)
    x = x @ params["patch_w"]
    cls = jnp.broadcast_to(params["class_emb"], (Bn, 1, WIDTH))
    x = jnp.concatenate([cls, x], 1) + params["pos_emb"][None]

    def ln(t, g, b):
        m = t.mean(-1, keepdims=True)
        v = ((t - m) ** 2).mean(-1, keepdims=True)
        return (t - m) / jnp.sqrt(v + LN_EPS) * g + b

    x = ln(x, params["ln_pre_g"], params["ln_pre_b"])
    for lp in params["layers"]:
        h = ln(x, lp["ln1_g"], lp["ln1_b"])
        qkv = h @ lp["attn_in_w"] + lp["attn_in_b"]
        q, k, v = jnp.split(qkv, 3, -1)

        def hsplit(t):
            return t.reshape(Bn, SEQ, HEADS, HEAD_DIM).transpose(0, 2, 1, 3)

        q, k, v = hsplit(q), hsplit(k), hsplit(v)
        s = jnp.einsum("bhqd,bhkd->bhqk", q, k) * (HEAD_DIM ** -0.5)
        p = jax.nn.softmax(s, -1)
        o = jnp.einsum("bhqk,bhkd->bhqd", p, v).transpose(0, 2, 1, 3).reshape(Bn, SEQ, WIDTH)
        x = x + (o @ lp["attn_out_w"] + lp["attn_out_b"])
        h = ln(x, lp["ln2_g"], lp["ln2_b"])
        h = h @ lp["fc_w"] + lp["fc_b"]
        h = h * jax.nn.sigmoid(1.702 * h)
        x = x + (h @ lp["proj_w"] + lp["proj_b"])
    cls_t = ln(x[:, 0], params["ln_post_g"], params["ln_post_b"])
    f = cls_t @ params["proj"]
    return f / jnp.linalg.norm(f, axis=-1, keepdims=True)


# ---------------------------- param init ----------------------------
def init_params(key):
    keys = jax.random.split(key, 128)
    it = iter(keys)

    def nrm(shape, std=0.02):
        return jax.random.normal(next(it), shape, jnp.float32) * std

    params = dict(
        patch_w=nrm((C_IN * PATCH * PATCH, WIDTH)),
        class_emb=nrm((WIDTH,)),
        pos_emb=nrm((SEQ, WIDTH)),
        ln_pre_g=1.0 + nrm((WIDTH,)), ln_pre_b=nrm((WIDTH,)),
        ln_post_g=1.0 + nrm((WIDTH,)), ln_post_b=nrm((WIDTH,)),
        proj=nrm((WIDTH, OUT_DIM)),
        layers=[],
    )
    for _ in range(LAYERS):
        params["layers"].append(dict(
            ln1_g=1.0 + nrm((WIDTH,)), ln1_b=nrm((WIDTH,)),
            attn_in_w=nrm((WIDTH, 3 * WIDTH)), attn_in_b=nrm((3 * WIDTH,)),
            attn_out_w=nrm((WIDTH, WIDTH)), attn_out_b=nrm((WIDTH,)),
            ln2_g=1.0 + nrm((WIDTH,)), ln2_b=nrm((WIDTH,)),
            fc_w=nrm((WIDTH, 4 * WIDTH)), fc_b=nrm((4 * WIDTH,)),
            proj_w=nrm((4 * WIDTH, WIDTH)), proj_b=nrm((WIDTH,)),
        ))
    return params


# ---------------------------- main ----------------------------
if __name__ == "__main__":
    key = jax.random.PRNGKey(0)
    kp, kx = jax.random.split(key)
    params = init_params(kp)

    pixel_values = jax.random.normal(kx, (B, C_IN, IMG, IMG), jnp.float32)
    input_ids = jnp.zeros((B, 8), jnp.int32)          # unused by forward()
    attention_mask = jnp.ones((B, 8), jnp.int32)      # unused by forward()

    fwd = jax.jit(custom_clip_forward)
    out = fwd(params, input_ids, attention_mask, pixel_values)
    out = jax.block_until_ready(out)

    ref = ref_forward(params, pixel_values)
    assert out.shape == (B, OUT_DIM)
    assert jnp.allclose(out, ref, atol=1e-4, rtol=1e-4), "mismatch vs reference"

    print("KERNEL_OK")
</pallas_src>

<mosaic_0001>
module attributes {stable_mosaic.version = 11 : i64} {
  func.func @clip_visual_fused_kernel(%arg0: memref<8x192xf32, #tpu.memory_space<vmem>>, %arg1: memref<192x32xf32, #tpu.memory_space<vmem>>, %arg2: memref<1x32xf32, #tpu.memory_space<vmem>>, %arg3: memref<5x32xf32, #tpu.memory_space<vmem>>, %arg4: memref<1x32xf32, #tpu.memory_space<vmem>>, %arg5: memref<1x32xf32, #tpu.memory_space<vmem>>, %arg6: memref<2x32xf32, #tpu.memory_space<vmem>>, %arg7: memref<2x32xf32, #tpu.memory_space<vmem>>, %arg8: memref<2x32x96xf32, #tpu.memory_space<vmem>>, %arg9: memref<2x96xf32, #tpu.memory_space<vmem>>, %arg10: memref<2x32x32xf32, #tpu.memory_space<vmem>>, %arg11: memref<2x32xf32, #tpu.memory_space<vmem>>, %arg12: memref<2x32xf32, #tpu.memory_space<vmem>>, %arg13: memref<2x32xf32, #tpu.memory_space<vmem>>, %arg14: memref<2x32x128xf32, #tpu.memory_space<vmem>>, %arg15: memref<2x128xf32, #tpu.memory_space<vmem>>, %arg16: memref<2x128x32xf32, #tpu.memory_space<vmem>>, %arg17: memref<2x32xf32, #tpu.memory_space<vmem>>, %arg18: memref<1x32xf32, #tpu.memory_space<vmem>>, %arg19: memref<1x32xf32, #tpu.memory_space<vmem>>, %arg20: memref<32x32xf32, #tpu.memory_space<vmem>>, %arg21: memref<2x32xf32, #tpu.memory_space<vmem>>) attributes {dimension_semantics = [], scalar_prefetch = 0 : i64, scratch_operands = 0 : i64, tpu.core_type = #tpu.core_type<tc>} {
    %c0 = arith.constant 0 : index
    %c0_0 = arith.constant 0 : index
    %0 = vector.load %arg0[%c0, %c0_0] : memref<8x192xf32, #tpu.memory_space<vmem>>, vector<8x192xf32>
    %c0_1 = arith.constant 0 : index
    %c0_2 = arith.constant 0 : index
    %1 = vector.load %arg1[%c0_1, %c0_2] : memref<192x32xf32, #tpu.memory_space<vmem>>, vector<192x32xf32>
    %cst = arith.constant dense<0.000000e+00> : vector<8x32xf32>
    %2 = tpu.matmul %0, %1, %cst {dimension_numbers = #tpu.dot_dimension_numbers<[1], [0], [0], [1], [0, 0, 1, 1], [], []>} : vector<8x192xf32>, vector<192x32xf32>, vector<8x32xf32> -> vector<8x32xf32>
    %c0_3 = arith.constant 0 : index
    %c0_4 = arith.constant 0 : index
    %3 = vector.load %arg2[%c0_3, %c0_4] : memref<1x32xf32, #tpu.memory_space<vmem>>, vector<1x32xf32>
    %c0_5 = arith.constant 0 : index
    %c0_6 = arith.constant 0 : index
    %4 = vector.load %arg3[%c0_5, %c0_6] : memref<5x32xf32, #tpu.memory_space<vmem>>, vector<5x32xf32>
    %5 = vector.extract_strided_slice %2 {offsets = [0, 0], sizes = [4, 32], strides = [1, 1]} : vector<8x32xf32> to vector<4x32xf32>
    %6 = vector.extract_strided_slice %2 {offsets = [4, 0], sizes = [4, 32], strides = [1, 1]} : vector<8x32xf32> to vector<4x32xf32>
    %7 = tpu.concatenate %3, %5, %3, %6 in 0 : vector<1x32xf32>, vector<4x32xf32>, vector<1x32xf32>, vector<4x32xf32> -> vector<10x32xf32>
    %8 = tpu.concatenate %4, %4 in 0 : vector<5x32xf32>, vector<5x32xf32> -> vector<10x32xf32>
    %9 = arith.addf %7, %8 : vector<10x32xf32>
    %c0_7 = arith.constant 0 : index
    %c0_8 = arith.constant 0 : index
    %10 = vector.load %arg4[%c0_7, %c0_8] : memref<1x32xf32, #tpu.memory_space<vmem>>, vector<1x32xf32>
    %c0_9 = arith.constant 0 : index
    %c0_10 = arith.constant 0 : index
    %11 = vector.load %arg5[%c0_9, %c0_10] : memref<1x32xf32, #tpu.memory_space<vmem>>, vector<1x32xf32>
    %cst_11 = arith.constant dense<0.000000e+00> : vector<10xf32>
    %12 = vector.multi_reduction <add>, %9, %cst_11 [1] : vector<10x32xf32> to vector<10xf32>
    %13 = vector.shape_cast %12 : vector<10xf32> to vector<10x1xf32>
    %cst_12 = arith.constant 3.200000e+01 : f32
    %14 = vector.broadcast %cst_12 : f32 to vector<10x1xf32>
    %15 = arith.divf %13, %14 : vector<10x1xf32>
    %16 = vector.broadcast %15 : vector<10x1xf32> to vector<10x32xf32>
    %17 = arith.subf %9, %16 : vector<10x32xf32>
    %18 = arith.mulf %17, %17 : vector<10x32xf32>
    %cst_13 = arith.constant dense<0.000000e+00> : vector<10xf32>
    %19 = vector.multi_reduction <add>, %18, %cst_13 [1] : vector<10x32xf32> to vector<10xf32>
    %20 = vector.shape_cast %19 : vector<10xf32> to vector<10x1xf32>
    %cst_14 = arith.constant 3.200000e+01 : f32
    %21 = vector.broadcast %cst_14 : f32 to vector<10x1xf32>
    %22 = arith.divf %20, %21 : vector<10x1xf32>
    %23 = vector.broadcast %15 : vector<10x1xf32> to vector<10x32xf32>
    %24 = arith.subf %9, %23 : vector<10x32xf32>
    %cst_15 = arith.constant 9.99999974E-6 : f32
    %25 = vector.broadcast %cst_15 : f32 to vector<10x1xf32>
    %26 = arith.addf %22, %25 : vector<10x1xf32>
    %27 = math.rsqrt %26 : vector<10x1xf32>
    %28 = vector.broadcast %27 : vector<10x1xf32> to vector<10x32xf32>
    %29 = arith.mulf %24, %28 : vector<10x32xf32>
    %30 = vector.broadcast %10 : vector<1x32xf32> to vector<10x32xf32>
    %31 = arith.mulf %29, %30 : vector<10x32xf32>
    %32 = vector.broadcast %11 : vector<1x32xf32> to vector<10x32xf32>
    %33 = arith.addf %31, %32 : vector<10x32xf32>
    %c0_16 = arith.constant 0 : index
    %c0_17 = arith.constant 0 : index
    %34 = vector.load %arg6[%c0_16, %c0_17] : memref<2x32xf32, #tpu.memory_space<vmem>>, vector<1x32xf32>
    %c0_18 = arith.constant 0 : index
    %c0_19 = arith.constant 0 : index
    %35 = vector.load %arg7[%c0_18, %c0_19] : memref<2x32xf32, #tpu.memory_space<vmem>>, vector<1x32xf32>
    %cst_20 = arith.constant dense<0.000000e+00> : vector<10xf32>
    %36 = vector.multi_reduction <add>, %33, %cst_20 [1] : vector<10x32xf32> to vector<10xf32>
    %37 = vector.shape_cast %36 : vector<10xf32> to vector<10x1xf32>
    %cst_21 = arith.constant 3.200000e+01 : f32
    %38 = vector.broadcast %cst_21 : f32 to vector<10x1xf32>
    %39 = arith.divf %37, %38 : vector<10x1xf32>
    %40 = vector.broadcast %39 : vector<10x1xf32> to vector<10x32xf32>
    %41 = arith.subf %33, %40 : vector<10x32xf32>
    %42 = arith.mulf %41, %41 : vector<10x32xf32>
    %cst_22 = arith.constant dense<0.000000e+00> : vector<10xf32>
    %43 = vector.multi_reduction <add>, %42, %cst_22 [1] : vector<10x32xf32> to vector<10xf32>
    %44 = vector.shape_cast %43 : vector<10xf32> to vector<10x1xf32>
    %cst_23 = arith.constant 3.200000e+01 : f32
    %45 = vector.broadcast %cst_23 : f32 to vector<10x1xf32>
    %46 = arith.divf %44, %45 : vector<10x1xf32>
    %47 = vector.broadcast %39 : vector<10x1xf32> to vector<10x32xf32>
    %48 = arith.subf %33, %47 : vector<10x32xf32>
    %cst_24 = arith.constant 9.99999974E-6 : f32
    %49 = vector.broadcast %cst_24 : f32 to vector<10x1xf32>
    %50 = arith.addf %46, %49 : vector<10x1xf32>
    %51 = math.rsqrt %50 : vector<10x1xf32>
    %52 = vector.broadcast %51 : vector<10x1xf32> to vector<10x32xf32>
    %53 = arith.mulf %48, %52 : vector<10x32xf32>
    %54 = vector.broadcast %34 : vector<1x32xf32> to vector<10x32xf32>
    %55 = arith.mulf %53, %54 : vector<10x32xf32>
    %56 = vector.broadcast %35 : vector<1x32xf32> to vector<10x32xf32>
    %57 = arith.addf %55, %56 : vector<10x32xf32>
    %c0_25 = arith.constant 0 : index
    %c0_26 = arith.constant 0 : index
    %c0_27 = arith.constant 0 : index
    %58 = vector.load %arg8[%c0_25, %c0_26, %c0_27] : memref<2x32x96xf32, #tpu.memory_space<vmem>>, vector<1x32x96xf32>
    %59 = vector.shape_cast %58 : vector<1x32x96xf32> to vector<32x96xf32>
    %cst_28 = arith.constant dense<0.000000e+00> : vector<10x96xf32>
    %60 = tpu.matmul %57, %59, %cst_28 {dimension_numbers = #tpu.dot_dimension_numbers<[1], [0], [0], [1], [0, 0, 1, 1], [], []>} : vector<10x32xf32>, vector<32x96xf32>, vector<10x96xf32> -> vector<10x96xf32>
    %c0_29 = arith.constant 0 : index
    %c0_30 = arith.constant 0 : index
    %61 = vector.load %arg9[%c0_29, %c0_30] : memref<2x96xf32, #tpu.memory_space<vmem>>, vector<1x96xf32>
    %62 = vector.broadcast %61 : vector<1x96xf32> to vector<10x96xf32>
    %63 = arith.addf %60, %62 : vector<10x96xf32>
    %64 = vector.extract_strided_slice %63 {offsets = [0, 0], sizes = [5, 32], strides = [1, 1]} : vector<10x96xf32> to vector<5x32xf32>
    %65 = vector.extract_strided_slice %63 {offsets = [0, 32], sizes = [5, 32], strides = [1, 1]} : vector<10x96xf32> to vector<5x32xf32>
    %66 = vector.extract_strided_slice %63 {offsets = [0, 64], sizes = [5, 32], strides = [1, 1]} : vector<10x96xf32> to vector<5x32xf32>
    %67 = vector.extract_strided_slice %64 {offsets = [0, 0], sizes = [5, 8], strides = [1, 1]} : vector<5x32xf32> to vector<5x8xf32>
    %68 = vector.extract_strided_slice %65 {offsets = [0, 0], sizes = [5, 8], strides = [1, 1]} : vector<5x32xf32> to vector<5x8xf32>
    %69 = vector.extract_strided_slice %66 {offsets = [0, 0], sizes = [5, 8], strides = [1, 1]} : vector<5x32xf32> to vector<5x8xf32>
    %cst_31 = arith.constant dense<0.000000e+00> : vector<5x5xf32>
    %70 = tpu.matmul %67, %68, %cst_31 {dimension_numbers = #tpu.dot_dimension_numbers<[1], [1], [0], [0], [0, 0, 1, 0], [], []>} : vector<5x8xf32>, vector<5x8xf32>, vector<5x5xf32> -> vector<5x5xf32>
    %cst_32 = arith.constant 0.353553385 : f32
    %71 = vector.broadcast %cst_32 : f32 to vector<5x5xf32>
    %72 = arith.mulf %70, %71 : vector<5x5xf32>
    %cst_33 = arith.constant dense<0xFF800000> : vector<5xf32>
    %73 = vector.multi_reduction <maximumf>, %72, %cst_33 [1] : vector<5x5xf32> to vector<5xf32>
    %74 = vector.shape_cast %73 : vector<5xf32> to vector<5x1xf32>
    %75 = vector.broadcast %74 : vector<5x1xf32> to vector<5x5xf32>
    %76 = arith.subf %72, %75 : vector<5x5xf32>
    %77 = math.exp %76 : vector<5x5xf32>
    %cst_34 = arith.constant dense<0.000000e+00> : vector<5xf32>
    %78 = vector.multi_reduction <add>, %77, %cst_34 [1] : vector<5x5xf32> to vector<5xf32>
    %79 = vector.shape_cast %78 : vector<5xf32> to vector<5x1xf32>
    %80 = vector.broadcast %79 : vector<5x1xf32> to vector<5x5xf32>
    %81 = arith.divf %77, %80 : vector<5x5xf32>
    %cst_35 = arith.constant dense<0.000000e+00> : vector<5x8xf32>
    %82 = tpu.matmul %81, %69, %cst_35 {dimension_numbers = #tpu.dot_dimension_numbers<[1], [0], [0], [1], [0, 0, 1, 1], [], []>} : vector<5x5xf32>, vector<5x8xf32>, vector<5x8xf32> -> vector<5x8xf32>
    %83 = vector.extract_strided_slice %64 {offsets = [0, 8], sizes = [5, 8], strides = [1, 1]} : vector<5x32xf32> to vector<5x8xf32>
    %84 = vector.extract_strided_slice %65 {offsets = [0, 8], sizes = [5, 8], strides = [1, 1]} : vector<5x32xf32> to vector<5x8xf32>
    %85 = vector.extract_strided_slice %66 {offsets = [0, 8], sizes = [5, 8], strides = [1, 1]} : vector<5x32xf32> to vector<5x8xf32>
    %cst_36 = arith.constant dense<0.000000e+00> : vector<5x5xf32>
    %86 = tpu.matmul %83, %84, %cst_36 {dimension_numbers = #tpu.dot_dimension_numbers<[1], [1], [0], [0], [0, 0, 1, 0], [], []>} : vector<5x8xf32>, vector<5x8xf32>, vector<5x5xf32> -> vector<5x5xf32>
    %cst_37 = arith.constant 0.353553385 : f32
    %87 = vector.broadcast %cst_37 : f32 to vector<5x5xf32>
    %88 = arith.mulf %86, %87 : vector<5x5xf32>
    %cst_38 = arith.constant dense<0xFF800000> : vector<5xf32>
    %89 = vector.multi_reduction <maximumf>, %88, %cst_38 [1] : vector<5x5xf32> to vector<5xf32>
    %90 = vector.shape_cast %89 : vector<5xf32> to vector<5x1xf32>
    %91 = vector.broadcast %90 : vector<5x1xf32> to vector<5x5xf32>
    %92 = arith.subf %88, %91 : vector<5x5xf32>
    %93 = math.exp %92 : vector<5x5xf32>
    %cst_39 = arith.constant dense<0.000000e+00> : vector<5xf32>
    %94 = vector.multi_reduction <add>, %93, %cst_39 [1] : vector<5x5xf32> to vector<5xf32>
    %95 = vector.shape_cast %94 : vector<5xf32> to vector<5x1xf32>
    %96 = vector.broadcast %95 : vector<5x1xf32> to vector<5x5xf32>
    %97 = arith.divf %93, %96 : vector<5x5xf32>
    %cst_40 = arith.constant dense<0.000000e+00> : vector<5x8xf32>
    %98 = tpu.matmul %97, %85, %cst_40 {dimension_numbers = #tpu.dot_dimension_numbers<[1], [0], [0], [1], [0, 0, 1, 1], [], []>} : vector<5x5xf32>, vector<5x8xf32>, vector<5x8xf32> -> vector<5x8xf32>
    %99 = vector.extract_strided_slice %64 {offsets = [0, 16], sizes = [5, 8], strides = [1, 1]} : vector<5x32xf32> to vector<5x8xf32>
    %100 = vector.extract_strided_slice %65 {offsets = [0, 16], sizes = [5, 8], strides = [1, 1]} : vector<5x32xf32> to vector<5x8xf32>
    %101 = vector.extract_strided_slice %66 {offsets = [0, 16], sizes = [5, 8], strides = [1, 1]} : vector<5x32xf32> to vector<5x8xf32>
    %cst_41 = arith.constant dense<0.000000e+00> : vector<5x5xf32>
    %102 = tpu.matmul %99, %100, %cst_41 {dimension_numbers = #tpu.dot_dimension_numbers<[1], [1], [0], [0], [0, 0, 1, 0], [], []>} : vector<5x8xf32>, vector<5x8xf32>, vector<5x5xf32> -> vector<5x5xf32>
    %cst_42 = arith.constant 0.353553385 : f32
    %103 = vector.broadcast %cst_42 : f32 to vector<5x5xf32>
    %104 = arith.mulf %102, %103 : vector<5x5xf32>
    %cst_43 = arith.constant dense<0xFF800000> : vector<5xf32>
    %105 = vector.multi_reduction <maximumf>, %104, %cst_43 [1] : vector<5x5xf32> to vector<5xf32>
    %106 = vector.shape_cast %105 : vector<5xf32> to vector<5x1xf32>
    %107 = vector.broadcast %106 : vector<5x1xf32> to vector<5x5xf32>
    %108 = arith.subf %104, %107 : vector<5x5xf32>
    %109 = math.exp %108 : vector<5x5xf32>
    %cst_44 = arith.constant dense<0.000000e+00> : vector<5xf32>
    %110 = vector.multi_reduction <add>, %109, %cst_44 [1] : vector<5x5xf32> to vector<5xf32>
    %111 = vector.shape_cast %110 : vector<5xf32> to vector<5x1xf32>
    %112 = vector.broadcast %111 : vector<5x1xf32> to vector<5x5xf32>
    %113 = arith.divf %109, %112 : vector<5x5xf32>
    %cst_45 = arith.constant dense<0.000000e+00> : vector<5x8xf32>
    %114 = tpu.matmul %113, %101, %cst_45 {dimension_numbers = #tpu.dot_dimension_numbers<[1], [0], [0], [1], [0, 0, 1, 1], [], []>} : vector<5x5xf32>, vector<5x8xf32>, vector<5x8xf32> -> vector<5x8xf32>
    %115 = vector.extract_strided_slice %64 {offsets = [0, 24], sizes = [5, 8], strides = [1, 1]} : vector<5x32xf32> to vector<5x8xf32>
    %116 = vector.extract_strided_slice %65 {offsets = [0, 24], sizes = [5, 8], strides = [1, 1]} : vector<5x32xf32> to vector<5x8xf32>
    %117 = vector.extract_strided_slice %66 {offsets = [0, 24], sizes = [5, 8], strides = [1, 1]} : vector<5x32xf32> to vector<5x8xf32>
    %cst_46 = arith.constant dense<0.000000e+00> : vector<5x5xf32>
    %118 = tpu.matmul %115, %116, %cst_46 {dimension_numbers = #tpu.dot_dimension_numbers<[1], [1], [0], [0], [0, 0, 1, 0], [], []>} : vector<5x8xf32>, vector<5x8xf32>, vector<5x5xf32> -> vector<5x5xf32>
    %cst_47 = arith.constant 0.353553385 : f32
    %119 = vector.broadcast %cst_47 : f32 to vector<5x5xf32>
    %120 = arith.mulf %118, %119 : vector<5x5xf32>
    %cst_48 = arith.constant dense<0xFF800000> : vector<5xf32>
    %121 = vector.multi_reduction <maximumf>, %120, %cst_48 [1] : vector<5x5xf32> to vector<5xf32>
    %122 = vector.shape_cast %121 : vector<5xf32> to vector<5x1xf32>
    %123 = vector.broadcast %122 : vector<5x1xf32> to vector<5x5xf32>
    %124 = arith.subf %120, %123 : vector<5x5xf32>
    %125 = math.exp %124 : vector<5x5xf32>
    %cst_49 = arith.constant dense<0.000000e+00> : vector<5xf32>
    %126 = vector.multi_reduction <add>, %125, %cst_49 [1] : vector<5x5xf32> to vector<5xf32>
    %127 = vector.shape_cast %126 : vector<5xf32> to vector<5x1xf32>
    %128 = vector.broadcast %127 : vector<5x1xf32> to vector<5x5xf32>
    %129 = arith.divf %125, %128 : vector<5x5xf32>
    %cst_50 = arith.constant dense<0.000000e+00> : vector<5x8xf32>
    %130 = tpu.matmul %129, %117, %cst_50 {dimension_numbers = #tpu.dot_dimension_numbers<[1], [0], [0], [1], [0, 0, 1, 1], [], []>} : vector<5x5xf32>, vector<5x8xf32>, vector<5x8xf32> -> vector<5x8xf32>
    %131 = tpu.concatenate %82, %98, %114, %130 in 1 : vector<5x8xf32>, vector<5x8xf32>, vector<5x8xf32>, vector<5x8xf32> -> vector<5x32xf32>
    %132 = vector.extract_strided_slice %63 {offsets = [5, 0], sizes = [5, 32], strides = [1, 1]} : vector<10x96xf32> to vector<5x32xf32>
    %133 = vector.extract_strided_slice %63 {offsets = [5, 32], sizes = [5, 32], strides = [1, 1]} : vector<10x96xf32> to vector<5x32xf32>
    %134 = vector.extract_strided_slice %63 {offsets = [5, 64], sizes = [5, 32], strides = [1, 1]} : vector<10x96xf32> to vector<5x32xf32>
    %135 = vector.extract_strided_slice %132 {offsets = [0, 0], sizes = [5, 8], strides = [1, 1]} : vector<5x32xf32> to vector<5x8xf32>
    %136 = vector.extract_strided_slice %133 {offsets = [0, 0], sizes = [5, 8], strides = [1, 1]} : vector<5x32xf32> to vector<5x8xf32>
    %137 = vector.extract_strided_slice %134 {offsets = [0, 0], sizes = [5, 8], strides = [1, 1]} : vector<5x32xf32> to vector<5x8xf32>
    %cst_51 = arith.constant dense<0.000000e+00> : vector<5x5xf32>
    %138 = tpu.matmul %135, %136, %cst_51 {dimension_numbers = #tpu.dot_dimension_numbers<[1], [1], [0], [0], [0, 0, 1, 0], [], []>} : vector<5x8xf32>, vector<5x8xf32>, vector<5x5xf32> -> vector<5x5xf32>
    %cst_52 = arith.constant 0.353553385 : f32
    %139 = vector.broadcast %cst_52 : f32 to vector<5x5xf32>
    %140 = arith.mulf %138, %139 : vector<5x5xf32>
    %cst_53 = arith.constant dense<0xFF800000> : vector<5xf32>
    %141 = vector.multi_reduction <maximumf>, %140, %cst_53 [1] : vector<5x5xf32> to vector<5xf32>
    %142 = vector.shape_cast %141 : vector<5xf32> to vector<5x1xf32>
    %143 = vector.broadcast %142 : vector<5x1xf32> to vector<5x5xf32>
    %144 = arith.subf %140, %143 : vector<5x5xf32>
    %145 = math.exp %144 : vector<5x5xf32>
    %cst_54 = arith.constant dense<0.000000e+00> : vector<5xf32>
    %146 = vector.multi_reduction <add>, %145, %cst_54 [1] : vector<5x5xf32> to vector<5xf32>
    %147 = vector.shape_cast %146 : vector<5xf32> to vector<5x1xf32>
    %148 = vector.broadcast %147 : vector<5x1xf32> to vector<5x5xf32>
    %149 = arith.divf %145, %148 : vector<5x5xf32>
    %cst_55 = arith.constant dense<0.000000e+00> : vector<5x8xf32>
    %150 = tpu.matmul %149, %137, %cst_55 {dimension_numbers = #tpu.dot_dimension_numbers<[1], [0], [0], [1], [0, 0, 1, 1], [], []>} : vector<5x5xf32>, vector<5x8xf32>, vector<5x8xf32> -> vector<5x8xf32>
    %151 = vector.extract_strided_slice %132 {offsets = [0, 8], sizes = [5, 8], strides = [1, 1]} : vector<5x32xf32> to vector<5x8xf32>
    %152 = vector.extract_strided_slice %133 {offsets = [0, 8], sizes = [5, 8], strides = [1, 1]} : vector<5x32xf32> to vector<5x8xf32>
    %153 = vector.extract_strided_slice %134 {offsets = [0, 8], sizes = [5, 8], strides = [1, 1]} : vector<5x32xf32> to vector<5x8xf32>
    %cst_56 = arith.constant dense<0.000000e+00> : vector<5x5xf32>
    %154 = tpu.matmul %151, %152, %cst_56 {dimension_numbers = #tpu.dot_dimension_numbers<[1], [1], [0], [0], [0, 0, 1, 0], [], []>} : vector<5x8xf32>, vector<5x8xf32>, vector<5x5xf32> -> vector<5x5xf32>
    %cst_57 = arith.constant 0.353553385 : f32
    %155 = vector.broadcast %cst_57 : f32 to vector<5x5xf32>
    %156 = arith.mulf %154, %155 : vector<5x5xf32>
    %cst_58 = arith.constant dense<0xFF800000> : vector<5xf32>
    %157 = vector.multi_reduction <maximumf>, %156, %cst_58 [1] : vector<5x5xf32> to vector<5xf32>
    %158 = vector.shape_cast %157 : vector<5xf32> to vector<5x1xf32>
    %159 = vector.broadcast %158 : vector<5x1xf32> to vector<5x5xf32>
    %160 = arith.subf %156, %159 : vector<5x5xf32>
    %161 = math.exp %160 : vector<5x5xf32>
    %cst_59 = arith.constant dense<0.000000e+00> : vector<5xf32>
    %162 = vector.multi_reduction <add>, %161, %cst_59 [1] : vector<5x5xf32> to vector<5xf32>
    %163 = vector.shape_cast %162 : vector<5xf32> to vector<5x1xf32>
    %164 = vector.broadcast %163 : vector<5x1xf32> to vector<5x5xf32>
    %165 = arith.divf %161, %164 : vector<5x5xf32>
    %cst_60 = arith.constant dense<0.000000e+00> : vector<5x8xf32>
    %166 = tpu.matmul %165, %153, %cst_60 {dimension_numbers = #tpu.dot_dimension_numbers<[1], [0], [0], [1], [0, 0, 1, 1], [], []>} : vector<5x5xf32>, vector<5x8xf32>, vector<5x8xf32> -> vector<5x8xf32>
    %167 = vector.extract_strided_slice %132 {offsets = [0, 16], sizes = [5, 8], strides = [1, 1]} : vector<5x32xf32> to vector<5x8xf32>
    %168 = vector.extract_strided_slice %133 {offsets = [0, 16], sizes = [5, 8], strides = [1, 1]} : vector<5x32xf32> to vector<5x8xf32>
    %169 = vector.extract_strided_slice %134 {offsets = [0, 16], sizes = [5, 8], strides = [1, 1]} : vector<5x32xf32> to vector<5x8xf32>
    %cst_61 = arith.constant dense<0.000000e+00> : vector<5x5xf32>
    %170 = tpu.matmul %167, %168, %cst_61 {dimension_numbers = #tpu.dot_dimension_numbers<[1], [1], [0], [0], [0, 0, 1, 0], [], []>} : vector<5x8xf32>, vector<5x8xf32>, vector<5x5xf32> -> vector<5x5xf32>
    %cst_62 = arith.constant 0.353553385 : f32
    %171 = vector.broadcast %cst_62 : f32 to vector<5x5xf32>
    %172 = arith.mulf %170, %171 : vector<5x5xf32>
    %cst_63 = arith.constant dense<0xFF800000> : vector<5xf32>
    %173 = vector.multi_reduction <maximumf>, %172, %cst_63 [1] : vector<5x5xf32> to vector<5xf32>
    %174 = vector.shape_cast %173 : vector<5xf32> to vector<5x1xf32>
    %175 = vector.broadcast %174 : vector<5x1xf32> to vector<5x5xf32>
    %176 = arith.subf %172, %175 : vector<5x5xf32>
    %177 = math.exp %176 : vector<5x5xf32>
    %cst_64 = arith.constant dense<0.000000e+00> : vector<5xf32>
    %178 = vector.multi_reduction <add>, %177, %cst_64 [1] : vector<5x5xf32> to vector<5xf32>
    %179 = vector.shape_cast %178 : vector<5xf32> to vector<5x1xf32>
    %180 = vector.broadcast %179 : vector<5x1xf32> to vector<5x5xf32>
    %181 = arith.divf %177, %180 : vector<5x5xf32>
    %cst_65 = arith.constant dense<0.000000e+00> : vector<5x8xf32>
    %182 = tpu.matmul %181, %169, %cst_65 {dimension_numbers = #tpu.dot_dimension_numbers<[1], [0], [0], [1], [0, 0, 1, 1], [], []>} : vector<5x5xf32>, vector<5x8xf32>, vector<5x8xf32> -> vector<5x8xf32>
    %183 = vector.extract_strided_slice %132 {offsets = [0, 24], sizes = [5, 8], strides = [1, 1]} : vector<5x32xf32> to vector<5x8xf32>
    %184 = vector.extract_strided_slice %133 {offsets = [0, 24], sizes = [5, 8], strides = [1, 1]} : vector<5x32xf32> to vector<5x8xf32>
    %185 = vector.extract_strided_slice %134 {offsets = [0, 24], sizes = [5, 8], strides = [1, 1]} : vector<5x32xf32> to vector<5x8xf32>
    %cst_66 = arith.constant dense<0.000000e+00> : vector<5x5xf32>
    %186 = tpu.matmul %183, %184, %cst_66 {dimension_numbers = #tpu.dot_dimension_numbers<[1], [1], [0], [0], [0, 0, 1, 0], [], []>} : vector<5x8xf32>, vector<5x8xf32>, vector<5x5xf32> -> vector<5x5xf32>
    %cst_67 = arith.constant 0.353553385 : f32
    %187 = vector.broadcast %cst_67 : f32 to vector<5x5xf32>
    %188 = arith.mulf %186, %187 : vector<5x5xf32>
    %cst_68 = arith.constant dense<0xFF800000> : vector<5xf32>
    %189 = vector.multi_reduction <maximumf>, %188, %cst_68 [1] : vector<5x5xf32> to vector<5xf32>
    %190 = vector.shape_cast %189 : vector<5xf32> to vector<5x1xf32>
    %191 = vector.broadcast %190 : vector<5x1xf32> to vector<5x5xf32>
    %192 = arith.subf %188, %191 : vector<5x5xf32>
    %193 = math.exp %192 : vector<5x5xf32>
    %cst_69 = arith.constant dense<0.000000e+00> : vector<5xf32>
    %194 = vector.multi_reduction <add>, %193, %cst_69 [1] : vector<5x5xf32> to vector<5xf32>
    %195 = vector.shape_cast %194 : vector<5xf32> to vector<5x1xf32>
    %196 = vector.broadcast %195 : vector<5x1xf32> to vector<5x5xf32>
    %197 = arith.divf %193, %196 : vector<5x5xf32>
    %cst_70 = arith.constant dense<0.000000e+00> : vector<5x8xf32>
    %198 = tpu.matmul %197, %185, %cst_70 {dimension_numbers = #tpu.dot_dimension_numbers<[1], [0], [0], [1], [0, 0, 1, 1], [], []>} : vector<5x5xf32>, vector<5x8xf32>, vector<5x8xf32> -> vector<5x8xf32>
    %199 = tpu.concatenate %150, %166, %182, %198 in 1 : vector<5x8xf32>, vector<5x8xf32>, vector<5x8xf32>, vector<5x8xf32> -> vector<5x32xf32>
    %200 = tpu.concatenate %131, %199 in 0 : vector<5x32xf32>, vector<5x32xf32> -> vector<10x32xf32>
    %c0_71 = arith.constant 0 : index
    %c0_72 = arith.constant 0 : index
    %c0_73 = arith.constant 0 : index
    %201 = vector.load %arg10[%c0_71, %c0_72, %c0_73] : memref<2x32x32xf32, #tpu.memory_space<vmem>>, vector<1x32x32xf32>
    %202 = vector.shape_cast %201 : vector<1x32x32xf32> to vector<32x32xf32>
    %cst_74 = arith.constant dense<0.000000e+00> : vector<10x32xf32>
    %203 = tpu.matmul %200, %202, %cst_74 {dimension_numbers = #tpu.dot_dimension_numbers<[1], [0], [0], [1], [0, 0, 1, 1], [], []>} : vector<10x32xf32>, vector<32x32xf32>, vector<10x32xf32> -> vector<10x32xf32>
    %c0_75 = arith.constant 0 : index
    %c0_76 = arith.constant 0 : index
    %204 = vector.load %arg11[%c0_75, %c0_76] : memref<2x32xf32, #tpu.memory_space<vmem>>, vector<1x32xf32>
    %205 = vector.broadcast %204 : vector<1x32xf32> to vector<10x32xf32>
    %206 = arith.addf %203, %205 : vector<10x32xf32>
    %207 = arith.addf %33, %206 : vector<10x32xf32>
    %c0_77 = arith.constant 0 : index
    %c0_78 = arith.constant 0 : index
    %208 = vector.load %arg12[%c0_77, %c0_78] : memref<2x32xf32, #tpu.memory_space<vmem>>, vector<1x32xf32>
    %c0_79 = arith.constant 0 : index
    %c0_80 = arith.constant 0 : index
    %209 = vector.load %arg13[%c0_79, %c0_80] : memref<2x32xf32, #tpu.memory_space<vmem>>, vector<1x32xf32>
    %cst_81 = arith.constant dense<0.000000e+00> : vector<10xf32>
    %210 = vector.multi_reduction <add>, %207, %cst_81 [1] : vector<10x32xf32> to vector<10xf32>
    %211 = vector.shape_cast %210 : vector<10xf32> to vector<10x1xf32>
    %cst_82 = arith.constant 3.200000e+01 : f32
    %212 = vector.broadcast %cst_82 : f32 to vector<10x1xf32>
    %213 = arith.divf %211, %212 : vector<10x1xf32>
    %214 = vector.broadcast %213 : vector<10x1xf32> to vector<10x32xf32>
    %215 = arith.subf %207, %214 : vector<10x32xf32>
    %216 = arith.mulf %215, %215 : vector<10x32xf32>
    %cst_83 = arith.constant dense<0.000000e+00> : vector<10xf32>
    %217 = vector.multi_reduction <add>, %216, %cst_83 [1] : vector<10x32xf32> to vector<10xf32>
    %218 = vector.shape_cast %217 : vector<10xf32> to vector<10x1xf32>
    %cst_84 = arith.constant 3.200000e+01 : f32
    %219 = vector.broadcast %cst_84 : f32 to vector<10x1xf32>
    %220 = arith.divf %218, %219 : vector<10x1xf32>
    %221 = vector.broadcast %213 : vector<10x1xf32> to vector<10x32xf32>
    %222 = arith.subf %207, %221 : vector<10x32xf32>
    %cst_85 = arith.constant 9.99999974E-6 : f32
    %223 = vector.broadcast %cst_85 : f32 to vector<10x1xf32>
    %224 = arith.addf %220, %223 : vector<10x1xf32>
    %225 = math.rsqrt %224 : vector<10x1xf32>
    %226 = vector.broadcast %225 : vector<10x1xf32> to vector<10x32xf32>
    %227 = arith.mulf %222, %226 : vector<10x32xf32>
    %228 = vector.broadcast %208 : vector<1x32xf32> to vector<10x32xf32>
    %229 = arith.mulf %227, %228 : vector<10x32xf32>
    %230 = vector.broadcast %209 : vector<1x32xf32> to vector<10x32xf32>
    %231 = arith.addf %229, %230 : vector<10x32xf32>
    %c0_86 = arith.constant 0 : index
    %c0_87 = arith.constant 0 : index
    %c0_88 = arith.constant 0 : index
    %232 = vector.load %arg14[%c0_86, %c0_87, %c0_88] : memref<2x32x128xf32, #tpu.memory_space<vmem>>, vector<1x32x128xf32>
    %233 = vector.shape_cast %232 : vector<1x32x128xf32> to vector<32x128xf32>
    %cst_89 = arith.constant dense<0.000000e+00> : vector<10x128xf32>
    %234 = tpu.matmul %231, %233, %cst_89 {dimension_numbers = #tpu.dot_dimension_numbers<[1], [0], [0], [1], [0, 0, 1, 1], [], []>} : vector<10x32xf32>, vector<32x128xf32>, vector<10x128xf32> -> vector<10x128xf32>
    %c0_90 = arith.constant 0 : index
    %c0_91 = arith.constant 0 : index
    %235 = vector.load %arg15[%c0_90, %c0_91] : memref<2x128xf32, #tpu.memory_space<vmem>>, vector<1x128xf32>
    %236 = vector.broadcast %235 : vector<1x128xf32> to vector<10x128xf32>
    %237 = arith.addf %234, %236 : vector<10x128xf32>
    %cst_92 = arith.constant 1.702000e+00 : f32
    %238 = vector.broadcast %cst_92 : f32 to vector<10x128xf32>
    %239 = arith.mulf %238, %237 : vector<10x128xf32>
    %240 = arith.negf %239 : vector<10x128xf32>
    %241 = math.exp %240 : vector<10x128xf32>
    %cst_93 = arith.constant 1.000000e+00 : f32
    %242 = vector.broadcast %cst_93 : f32 to vector<10x128xf32>
    %243 = arith.addf %242, %241 : vector<10x128xf32>
    %244 = arith.divf %242, %243 : vector<10x128xf32>
    %245 = arith.mulf %237, %244 : vector<10x128xf32>
    %c0_94 = arith.constant 0 : index
    %c0_95 = arith.constant 0 : index
    %c0_96 = arith.constant 0 : index
    %246 = vector.load %arg16[%c0_94, %c0_95, %c0_96] : memref<2x128x32xf32, #tpu.memory_space<vmem>>, vector<1x128x32xf32>
    %247 = vector.shape_cast %246 : vector<1x128x32xf32> to vector<128x32xf32>
    %cst_97 = arith.constant dense<0.000000e+00> : vector<10x32xf32>
    %248 = tpu.matmul %245, %247, %cst_97 {dimension_numbers = #tpu.dot_dimension_numbers<[1], [0], [0], [1], [0, 0, 1, 1], [], []>} : vector<10x128xf32>, vector<128x32xf32>, vector<10x32xf32> -> vector<10x32xf32>
    %c0_98 = arith.constant 0 : index
    %c0_99 = arith.constant 0 : index
    %249 = vector.load %arg17[%c0_98, %c0_99] : memref<2x32xf32, #tpu.memory_space<vmem>>, vector<1x32xf32>
    %250 = vector.broadcast %249 : vector<1x32xf32> to vector<10x32xf32>
    %251 = arith.addf %248, %250 : vector<10x32xf32>
    %252 = arith.addf %207, %251 : vector<10x32xf32>
    %c1 = arith.constant 1 : index
    %c0_100 = arith.constant 0 : index
    %253 = vector.load %arg6[%c1, %c0_100] : memref<2x32xf32, #tpu.memory_space<vmem>>, vector<1x32xf32>
    %c1_101 = arith.constant 1 : index
    %c0_102 = arith.constant 0 : index
    %254 = vector.load %arg7[%c1_101, %c0_102] : memref<2x32xf32, #tpu.memory_space<vmem>>, vector<1x32xf32>
    %cst_103 = arith.constant dense<0.000000e+00> : vector<10xf32>
    %255 = vector.multi_reduction <add>, %252, %cst_103 [1] : vector<10x32xf32> to vector<10xf32>
    %256 = vector.shape_cast %255 : vector<10xf32> to vector<10x1xf32>
    %cst_104 = arith.constant 3.200000e+01 : f32
    %257 = vector.broadcast %cst_104 : f32 to vector<10x1xf32>
    %258 = arith.divf %256, %257 : vector<10x1xf32>
    %259 = vector.broadcast %258 : vector<10x1xf32> to vector<10x32xf32>
    %260 = arith.subf %252, %259 : vector<10x32xf32>
    %261 = arith.mulf %260, %260 : vector<10x32xf32>
    %cst_105 = arith.constant dense<0.000000e+00> : vector<10xf32>
    %262 = vector.multi_reduction <add>, %261, %cst_105 [1] : vector<10x32xf32> to vector<10xf32>
    %263 = vector.shape_cast %262 : vector<10xf32> to vector<10x1xf32>
    %cst_106 = arith.constant 3.200000e+01 : f32
    %264 = vector.broadcast %cst_106 : f32 to vector<10x1xf32>
    %265 = arith.divf %263, %264 : vector<10x1xf32>
    %266 = vector.broadcast %258 : vector<10x1xf32> to vector<10x32xf32>
    %267 = arith.subf %252, %266 : vector<10x32xf32>
    %cst_107 = arith.constant 9.99999974E-6 : f32
    %268 = vector.broadcast %cst_107 : f32 to vector<10x1xf32>
    %269 = arith.addf %265, %268 : vector<10x1xf32>
    %270 = math.rsqrt %269 : vector<10x1xf32>
    %271 = vector.broadcast %270 : vector<10x1xf32> to vector<10x32xf32>
    %272 = arith.mulf %267, %271 : vector<10x32xf32>
    %273 = vector.broadcast %253 : vector<1x32xf32> to vector<10x32xf32>
    %274 = arith.mulf %272, %273 : vector<10x32xf32>
    %275 = vector.broadcast %254 : vector<1x32xf32> to vector<10x32xf32>
    %276 = arith.addf %274, %275 : vector<10x32xf32>
    %c1_108 = arith.constant 1 : index
    %c0_109 = arith.constant 0 : index
    %c0_110 = arith.constant 0 : index
    %277 = vector.load %arg8[%c1_108, %c0_109, %c0_110] : memref<2x32x96xf32, #tpu.memory_space<vmem>>, vector<1x32x96xf32>
    %278 = vector.shape_cast %277 : vector<1x32x96xf32> to vector<32x96xf32>
    %cst_111 = arith.constant dense<0.000000e+00> : vector<10x96xf32>
    %279 = tpu.matmul %276, %278, %cst_111 {dimension_numbers = #tpu.dot_dimension_numbers<[1], [0], [0], [1], [0, 0, 1, 1], [], []>} : vector<10x32xf32>, vector<32x96xf32>, vector<10x96xf32> -> vector<10x96xf32>
    %c1_112 = arith.constant 1 : index
    %c0_113 = arith.constant 0 : index
    %280 = vector.load %arg9[%c1_112, %c0_113] : memref<2x96xf32, #tpu.memory_space<vmem>>, vector<1x96xf32>
    %281 = vector.broadcast %280 : vector<1x96xf32> to vector<10x96xf32>
    %282 = arith.addf %279, %281 : vector<10x96xf32>
    %283 = vector.extract_strided_slice %282 {offsets = [0, 0], sizes = [5, 32], strides = [1, 1]} : vector<10x96xf32> to vector<5x32xf32>
    %284 = vector.extract_strided_slice %282 {offsets = [0, 32], sizes = [5, 32], strides = [1, 1]} : vector<10x96xf32> to vector<5x32xf32>
    %285 = vector.extract_strided_slice %282 {offsets = [0, 64], sizes = [5, 32], strides = [1, 1]} : vector<10x96xf32> to vector<5x32xf32>
    %286 = vector.extract_strided_slice %283 {offsets = [0, 0], sizes = [5, 8], strides = [1, 1]} : vector<5x32xf32> to vector<5x8xf32>
    %287 = vector.extract_strided_slice %284 {offsets = [0, 0], sizes = [5, 8], strides = [1, 1]} : vector<5x32xf32> to vector<5x8xf32>
    %288 = vector.extract_strided_slice %285 {offsets = [0, 0], sizes = [5, 8], strides = [1, 1]} : vector<5x32xf32> to vector<5x8xf32>
    %cst_114 = arith.constant dense<0.000000e+00> : vector<5x5xf32>
    %289 = tpu.matmul %286, %287, %cst_114 {dimension_numbers = #tpu.dot_dimension_numbers<[1], [1], [0], [0], [0, 0, 1, 0], [], []>} : vector<5x8xf32>, vector<5x8xf32>, vector<5x5xf32> -> vector<5x5xf32>
    %cst_115 = arith.constant 0.353553385 : f32
    %290 = vector.broadcast %cst_115 : f32 to vector<5x5xf32>
    %291 = arith.mulf %289, %290 : vector<5x5xf32>
    %cst_116 = arith.constant dense<0xFF800000> : vector<5xf32>
    %292 = vector.multi_reduction <maximumf>, %291, %cst_116 [1] : vector<5x5xf32> to vector<5xf32>
    %293 = vector.shape_cast %292 : vector<5xf32> to vector<5x1xf32>
    %294 = vector.broadcast %293 : vector<5x1xf32> to vector<5x5xf32>
    %295 = arith.subf %291, %294 : vector<5x5xf32>
    %296 = math.exp %295 : vector<5x5xf32>
    %cst_117 = arith.constant dense<0.000000e+00> : vector<5xf32>
    %297 = vector.multi_reduction <add>, %296, %cst_117 [1] : vector<5x5xf32> to vector<5xf32>
    %298 = vector.shape_cast %297 : vector<5xf32> to vector<5x1xf32>
    %299 = vector.broadcast %298 : vector<5x1xf32> to vector<5x5xf32>
    %300 = arith.divf %296, %299 : vector<5x5xf32>
    %cst_118 = arith.constant dense<0.000000e+00> : vector<5x8xf32>
    %301 = tpu.matmul %300, %288, %cst_118 {dimension_numbers = #tpu.dot_dimension_numbers<[1], [0], [0], [1], [0, 0, 1, 1], [], []>} : vector<5x5xf32>, vector<5x8xf32>, vector<5x8xf32> -> vector<5x8xf32>
    %302 = vector.extract_strided_slice %283 {offsets = [0, 8], sizes = [5, 8], strides = [1, 1]} : vector<5x32xf32> to vector<5x8xf32>
    %303 = vector.extract_strided_slice %284 {offsets = [0, 8], sizes = [5, 8], strides = [1, 1]} : vector<5x32xf32> to vector<5x8xf32>
    %304 = vector.extract_strided_slice %285 {offsets = [0, 8], sizes = [5, 8], strides = [1, 1]} : vector<5x32xf32> to vector<5x8xf32>
    %cst_119 = arith.constant dense<0.000000e+00> : vector<5x5xf32>
    %305 = tpu.matmul %302, %303, %cst_119 {dimension_numbers = #tpu.dot_dimension_numbers<[1], [1], [0], [0], [0, 0, 1, 0], [], []>} : vector<5x8xf32>, vector<5x8xf32>, vector<5x5xf32> -> vector<5x5xf32>
    %cst_120 = arith.constant 0.353553385 : f32
    %306 = vector.broadcast %cst_120 : f32 to vector<5x5xf32>
    %307 = arith.mulf %305, %306 : vector<5x5xf32>
    %cst_121 = arith.constant dense<0xFF800000> : vector<5xf32>
    %308 = vector.multi_reduction <maximumf>, %307, %cst_121 [1] : vector<5x5xf32> to vector<5xf32>
    %309 = vector.shape_cast %308 : vector<5xf32> to vector<5x1xf32>
    %310 = vector.broadcast %309 : vector<5x1xf32> to vector<5x5xf32>
    %311 = arith.subf %307, %310 : vector<5x5xf32>
    %312 = math.exp %311 : vector<5x5xf32>
    %cst_122 = arith.constant dense<0.000000e+00> : vector<5xf32>
    %313 = vector.multi_reduction <add>, %312, %cst_122 [1] : vector<5x5xf32> to vector<5xf32>
    %314 = vector.shape_cast %313 : vector<5xf32> to vector<5x1xf32>
    %315 = vector.broadcast %314 : vector<5x1xf32> to vector<5x5xf32>
    %316 = arith.divf %312, %315 : vector<5x5xf32>
    %cst_123 = arith.constant dense<0.000000e+00> : vector<5x8xf32>
    %317 = tpu.matmul %316, %304, %cst_123 {dimension_numbers = #tpu.dot_dimension_numbers<[1], [0], [0], [1], [0, 0, 1, 1], [], []>} : vector<5x5xf32>, vector<5x8xf32>, vector<5x8xf32> -> vector<5x8xf32>
    %318 = vector.extract_strided_slice %283 {offsets = [0, 16], sizes = [5, 8], strides = [1, 1]} : vector<5x32xf32> to vector<5x8xf32>
    %319 = vector.extract_strided_slice %284 {offsets = [0, 16], sizes = [5, 8], strides = [1, 1]} : vector<5x32xf32> to vector<5x8xf32>
    %320 = vector.extract_strided_slice %285 {offsets = [0, 16], sizes = [5, 8], strides = [1, 1]} : vector<5x32xf32> to vector<5x8xf32>
    %cst_124 = arith.constant dense<0.000000e+00> : vector<5x5xf32>
    %321 = tpu.matmul %318, %319, %cst_124 {dimension_numbers = #tpu.dot_dimension_numbers<[1], [1], [0], [0], [0, 0, 1, 0], [], []>} : vector<5x8xf32>, vector<5x8xf32>, vector<5x5xf32> -> vector<5x5xf32>
    %cst_125 = arith.constant 0.353553385 : f32
    %322 = vector.broadcast %cst_125 : f32 to vector<5x5xf32>
    %323 = arith.mulf %321, %322 : vector<5x5xf32>
    %cst_126 = arith.constant dense<0xFF800000> : vector<5xf32>
    %324 = vector.multi_reduction <maximumf>, %323, %cst_126 [1] : vector<5x5xf32> to vector<5xf32>
    %325 = vector.shape_cast %324 : vector<5xf32> to vector<5x1xf32>
    %326 = vector.broadcast %325 : vector<5x1xf32> to vector<5x5xf32>
    %327 = arith.subf %323, %326 : vector<5x5xf32>
    %328 = math.exp %327 : vector<5x5xf32>
    %cst_127 = arith.constant dense<0.000000e+00> : vector<5xf32>
    %329 = vector.multi_reduction <add>, %328, %cst_127 [1] : vector<5x5xf32> to vector<5xf32>
    %330 = vector.shape_cast %329 : vector<5xf32> to vector<5x1xf32>
    %331 = vector.broadcast %330 : vector<5x1xf32> to vector<5x5xf32>
    %332 = arith.divf %328, %331 : vector<5x5xf32>
    %cst_128 = arith.constant dense<0.000000e+00> : vector<5x8xf32>
    %333 = tpu.matmul %332, %320, %cst_128 {dimension_numbers = #tpu.dot_dimension_numbers<[1], [0], [0], [1], [0, 0, 1, 1], [], []>} : vector<5x5xf32>, vector<5x8xf32>, vector<5x8xf32> -> vector<5x8xf32>
    %334 = vector.extract_strided_slice %283 {offsets = [0, 24], sizes = [5, 8], strides = [1, 1]} : vector<5x32xf32> to vector<5x8xf32>
    %335 = vector.extract_strided_slice %284 {offsets = [0, 24], sizes = [5, 8], strides = [1, 1]} : vector<5x32xf32> to vector<5x8xf32>
    %336 = vector.extract_strided_slice %285 {offsets = [0, 24], sizes = [5, 8], strides = [1, 1]} : vector<5x32xf32> to vector<5x8xf32>
    %cst_129 = arith.constant dense<0.000000e+00> : vector<5x5xf32>
    %337 = tpu.matmul %334, %335, %cst_129 {dimension_numbers = #tpu.dot_dimension_numbers<[1], [1], [0], [0], [0, 0, 1, 0], [], []>} : vector<5x8xf32>, vector<5x8xf32>, vector<5x5xf32> -> vector<5x5xf32>
    %cst_130 = arith.constant 0.353553385 : f32
    %338 = vector.broadcast %cst_130 : f32 to vector<5x5xf32>
    %339 = arith.mulf %337, %338 : vector<5x5xf32>
    %cst_131 = arith.constant dense<0xFF800000> : vector<5xf32>
    %340 = vector.multi_reduction <maximumf>, %339, %cst_131 [1] : vector<5x5xf32> to vector<5xf32>
    %341 = vector.shape_cast %340 : vector<5xf32> to vector<5x1xf32>
    %342 = vector.broadcast %341 : vector<5x1xf32> to vector<5x5xf32>
    %343 = arith.subf %339, %342 : vector<5x5xf32>
    %344 = math.exp %343 : vector<5x5xf32>
    %cst_132 = arith.constant dense<0.000000e+00> : vector<5xf32>
    %345 = vector.multi_reduction <add>, %344, %cst_132 [1] : vector<5x5xf32> to vector<5xf32>
    %346 = vector.shape_cast %345 : vector<5xf32> to vector<5x1xf32>
    %347 = vector.broadcast %346 : vector<5x1xf32> to vector<5x5xf32>
    %348 = arith.divf %344, %347 : vector<5x5xf32>
    %cst_133 = arith.constant dense<0.000000e+00> : vector<5x8xf32>
    %349 = tpu.matmul %348, %336, %cst_133 {dimension_numbers = #tpu.dot_dimension_numbers<[1], [0], [0], [1], [0, 0, 1, 1], [], []>} : vector<5x5xf32>, vector<5x8xf32>, vector<5x8xf32> -> vector<5x8xf32>
    %350 = tpu.concatenate %301, %317, %333, %349 in 1 : vector<5x8xf32>, vector<5x8xf32>, vector<5x8xf32>, vector<5x8xf32> -> vector<5x32xf32>
    %351 = vector.extract_strided_slice %282 {offsets = [5, 0], sizes = [5, 32], strides = [1, 1]} : vector<10x96xf32> to vector<5x32xf32>
    %352 = vector.extract_strided_slice %282 {offsets = [5, 32], sizes = [5, 32], strides = [1, 1]} : vector<10x96xf32> to vector<5x32xf32>
    %353 = vector.extract_strided_slice %282 {offsets = [5, 64], sizes = [5, 32], strides = [1, 1]} : vector<10x96xf32> to vector<5x32xf32>
    %354 = vector.extract_strided_slice %351 {offsets = [0, 0], sizes = [5, 8], strides = [1, 1]} : vector<5x32xf32> to vector<5x8xf32>
    %355 = vector.extract_strided_slice %352 {offsets = [0, 0], sizes = [5, 8], strides = [1, 1]} : vector<5x32xf32> to vector<5x8xf32>
    %356 = vector.extract_strided_slice %353 {offsets = [0, 0], sizes = [5, 8], strides = [1, 1]} : vector<5x32xf32> to vector<5x8xf32>
    %cst_134 = arith.constant dense<0.000000e+00> : vector<5x5xf32>
    %357 = tpu.matmul %354, %355, %cst_134 {dimension_numbers = #tpu.dot_dimension_numbers<[1], [1], [0], [0], [0, 0, 1, 0], [], []>} : vector<5x8xf32>, vector<5x8xf32>, vector<5x5xf32> -> vector<5x5xf32>
    %cst_135 = arith.constant 0.353553385 : f32
    %358 = vector.broadcast %cst_135 : f32 to vector<5x5xf32>
    %359 = arith.mulf %357, %358 : vector<5x5xf32>
    %cst_136 = arith.constant dense<0xFF800000> : vector<5xf32>
    %360 = vector.multi_reduction <maximumf>, %359, %cst_136 [1] : vector<5x5xf32> to vector<5xf32>
    %361 = vector.shape_cast %360 : vector<5xf32> to vector<5x1xf32>
    %362 = vector.broadcast %361 : vector<5x1xf32> to vector<5x5xf32>
    %363 = arith.subf %359, %362 : vector<5x5xf32>
    %364 = math.exp %363 : vector<5x5xf32>
    %cst_137 = arith.constant dense<0.000000e+00> : vector<5xf32>
    %365 = vector.multi_reduction <add>, %364, %cst_137 [1] : vector<5x5xf32> to vector<5xf32>
    %366 = vector.shape_cast %365 : vector<5xf32> to vector<5x1xf32>
    %367 = vector.broadcast %366 : vector<5x1xf32> to vector<5x5xf32>
    %368 = arith.divf %364, %367 : vector<5x5xf32>
    %cst_138 = arith.constant dense<0.000000e+00> : vector<5x8xf32>
    %369 = tpu.matmul %368, %356, %cst_138 {dimension_numbers = #tpu.dot_dimension_numbers<[1], [0], [0], [1], [0, 0, 1, 1], [], []>} : vector<5x5xf32>, vector<5x8xf32>, vector<5x8xf32> -> vector<5x8xf32>
    %370 = vector.extract_strided_slice %351 {offsets = [0, 8], sizes = [5, 8], strides = [1, 1]} : vector<5x32xf32> to vector<5x8xf32>
    %371 = vector.extract_strided_slice %352 {offsets = [0, 8], sizes = [5, 8], strides = [1, 1]} : vector<5x32xf32> to vector<5x8xf32>
    %372 = vector.extract_strided_slice %353 {offsets = [0, 8], sizes = [5, 8], strides = [1, 1]} : vector<5x32xf32> to vector<5x8xf32>
    %cst_139 = arith.constant dense<0.000000e+00> : vector<5x5xf32>
    %373 = tpu.matmul %370, %371, %cst_139 {dimension_numbers = #tpu.dot_dimension_numbers<[1], [1], [0], [0], [0, 0, 1, 0], [], []>} : vector<5x8xf32>, vector<5x8xf32>, vector<5x5xf32> -> vector<5x5xf32>
    %cst_140 = arith.constant 0.353553385 : f32
    %374 = vector.broadcast %cst_140 : f32 to vector<5x5xf32>
    %375 = arith.mulf %373, %374 : vector<5x5xf32>
    %cst_141 = arith.constant dense<0xFF800000> : vector<5xf32>
    %376 = vector.multi_reduction <maximumf>, %375, %cst_141 [1] : vector<5x5xf32> to vector<5xf32>
    %377 = vector.shape_cast %376 : vector<5xf32> to vector<5x1xf32>
    %378 = vector.broadcast %377 : vector<5x1xf32> to vector<5x5xf32>
    %379 = arith.subf %375, %378 : vector<5x5xf32>
    %380 = math.exp %379 : vector<5x5xf32>
    %cst_142 = arith.constant dense<0.000000e+00> : vector<5xf32>
    %381 = vector.multi_reduction <add>, %380, %cst_142 [1] : vector<5x5xf32> to vector<5xf32>
    %382 = vector.shape_cast %381 : vector<5xf32> to vector<5x1xf32>
    %383 = vector.broadcast %382 : vector<5x1xf32> to vector<5x5xf32>
    %384 = arith.divf %380, %383 : vector<5x5xf32>
    %cst_143 = arith.constant dense<0.000000e+00> : vector<5x8xf32>
    %385 = tpu.matmul %384, %372, %cst_143 {dimension_numbers = #tpu.dot_dimension_numbers<[1], [0], [0], [1], [0, 0, 1, 1], [], []>} : vector<5x5xf32>, vector<5x8xf32>, vector<5x8xf32> -> vector<5x8xf32>
    %386 = vector.extract_strided_slice %351 {offsets = [0, 16], sizes = [5, 8], strides = [1, 1]} : vector<5x32xf32> to vector<5x8xf32>
    %387 = vector.extract_strided_slice %352 {offsets = [0, 16], sizes = [5, 8], strides = [1, 1]} : vector<5x32xf32> to vector<5x8xf32>
    %388 = vector.extract_strided_slice %353 {offsets = [0, 16], sizes = [5, 8], strides = [1, 1]} : vector<5x32xf32> to vector<5x8xf32>
    %cst_144 = arith.constant dense<0.000000e+00> : vector<5x5xf32>
    %389 = tpu.matmul %386, %387, %cst_144 {dimension_numbers = #tpu.dot_dimension_numbers<[1], [1], [0], [0], [0, 0, 1, 0], [], []>} : vector<5x8xf32>, vector<5x8xf32>, vector<5x5xf32> -> vector<5x5xf32>
    %cst_145 = arith.constant 0.353553385 : f32
    %390 = vector.broadcast %cst_145 : f32 to vector<5x5xf32>
    %391 = arith.mulf %389, %390 : vector<5x5xf32>
    %cst_146 = arith.constant dense<0xFF800000> : vector<5xf32>
    %392 = vector.multi_reduction <maximumf>, %391, %cst_146 [1] : vector<5x5xf32> to vector<5xf32>
    %393 = vector.shape_cast %392 : vector<5xf32> to vector<5x1xf32>
    %394 = vector.broadcast %393 : vector<5x1xf32> to vector<5x5xf32>
    %395 = arith.subf %391, %394 : vector<5x5xf32>
    %396 = math.exp %395 : vector<5x5xf32>
    %cst_147 = arith.constant dense<0.000000e+00> : vector<5xf32>
    %397 = vector.multi_reduction <add>, %396, %cst_147 [1] : vector<5x5xf32> to vector<5xf32>
    %398 = vector.shape_cast %397 : vector<5xf32> to vector<5x1xf32>
    %399 = vector.broadcast %398 : vector<5x1xf32> to vector<5x5xf32>
    %400 = arith.divf %396, %399 : vector<5x5xf32>
    %cst_148 = arith.constant dense<0.000000e+00> : vector<5x8xf32>
    %401 = tpu.matmul %400, %388, %cst_148 {dimension_numbers = #tpu.dot_dimension_numbers<[1], [0], [0], [1], [0, 0, 1, 1], [], []>} : vector<5x5xf32>, vector<5x8xf32>, vector<5x8xf32> -> vector<5x8xf32>
    %402 = vector.extract_strided_slice %351 {offsets = [0, 24], sizes = [5, 8], strides = [1, 1]} : vector<5x32xf32> to vector<5x8xf32>
    %403 = vector.extract_strided_slice %352 {offsets = [0, 24], sizes = [5, 8], strides = [1, 1]} : vector<5x32xf32> to vector<5x8xf32>
    %404 = vector.extract_strided_slice %353 {offsets = [0, 24], sizes = [5, 8], strides = [1, 1]} : vector<5x32xf32> to vector<5x8xf32>
    %cst_149 = arith.constant dense<0.000000e+00> : vector<5x5xf32>
    %405 = tpu.matmul %402, %403, %cst_149 {dimension_numbers = #tpu.dot_dimension_numbers<[1], [1], [0], [0], [0, 0, 1, 0], [], []>} : vector<5x8xf32>, vector<5x8xf32>, vector<5x5xf32> -> vector<5x5xf32>
    %cst_150 = arith.constant 0.353553385 : f32
    %406 = vector.broadcast %cst_150 : f32 to vector<5x5xf32>
    %407 = arith.mulf %405, %406 : vector<5x5xf32>
    %cst_151 = arith.constant dense<0xFF800000> : vector<5xf32>
    %408 = vector.multi_reduction <maximumf>, %407, %cst_151 [1] : vector<5x5xf32> to vector<5xf32>
    %409 = vector.shape_cast %408 : vector<5xf32> to vector<5x1xf32>
    %410 = vector.broadcast %409 : vector<5x1xf32> to vector<5x5xf32>
    %411 = arith.subf %407, %410 : vector<5x5xf32>
    %412 = math.exp %411 : vector<5x5xf32>
    %cst_152 = arith.constant dense<0.000000e+00> : vector<5xf32>
    %413 = vector.multi_reduction <add>, %412, %cst_152 [1] : vector<5x5xf32> to vector<5xf32>
    %414 = vector.shape_cast %413 : vector<5xf32> to vector<5x1xf32>
    %415 = vector.broadcast %414 : vector<5x1xf32> to vector<5x5xf32>
    %416 = arith.divf %412, %415 : vector<5x5xf32>
    %cst_153 = arith.constant dense<0.000000e+00> : vector<5x8xf32>
    %417 = tpu.matmul %416, %404, %cst_153 {dimension_numbers = #tpu.dot_dimension_numbers<[1], [0], [0], [1], [0, 0, 1, 1], [], []>} : vector<5x5xf32>, vector<5x8xf32>, vector<5x8xf32> -> vector<5x8xf32>
    %418 = tpu.concatenate %369, %385, %401, %417 in 1 : vector<5x8xf32>, vector<5x8xf32>, vector<5x8xf32>, vector<5x8xf32> -> vector<5x32xf32>
    %419 = tpu.concatenate %350, %418 in 0 : vector<5x32xf32>, vector<5x32xf32> -> vector<10x32xf32>
    %c1_154 = arith.constant 1 : index
    %c0_155 = arith.constant 0 : index
    %c0_156 = arith.constant 0 : index
    %420 = vector.load %arg10[%c1_154, %c0_155, %c0_156] : memref<2x32x32xf32, #tpu.memory_space<vmem>>, vector<1x32x32xf32>
    %421 = vector.shape_cast %420 : vector<1x32x32xf32> to vector<32x32xf32>
    %cst_157 = arith.constant dense<0.000000e+00> : vector<10x32xf32>
    %422 = tpu.matmul %419, %421, %cst_157 {dimension_numbers = #tpu.dot_dimension_numbers<[1], [0], [0], [1], [0, 0, 1, 1], [], []>} : vector<10x32xf32>, vector<32x32xf32>, vector<10x32xf32> -> vector<10x32xf32>
    %c1_158 = arith.constant 1 : index
    %c0_159 = arith.constant 0 : index
    %423 = vector.load %arg11[%c1_158, %c0_159] : memref<2x32xf32, #tpu.memory_space<vmem>>, vector<1x32xf32>
    %424 = vector.broadcast %423 : vector<1x32xf32> to vector<10x32xf32>
    %425 = arith.addf %422, %424 : vector<10x32xf32>
    %426 = arith.addf %252, %425 : vector<10x32xf32>
    %c1_160 = arith.constant 1 : index
    %c0_161 = arith.constant 0 : index
    %427 = vector.load %arg12[%c1_160, %c0_161] : memref<2x32xf32, #tpu.memory_space<vmem>>, vector<1x32xf32>
    %c1_162 = arith.constant 1 : index
    %c0_163 = arith.constant 0 : index
    %428 = vector.load %arg13[%c1_162, %c0_163] : memref<2x32xf32, #tpu.memory_space<vmem>>, vector<1x32xf32>
    %cst_164 = arith.constant dense<0.000000e+00> : vector<10xf32>
    %429 = vector.multi_reduction <add>, %426, %cst_164 [1] : vector<10x32xf32> to vector<10xf32>
    %430 = vector.shape_cast %429 : vector<10xf32> to vector<10x1xf32>
    %cst_165 = arith.constant 3.200000e+01 : f32
    %431 = vector.broadcast %cst_165 : f32 to vector<10x1xf32>
    %432 = arith.divf %430, %431 : vector<10x1xf32>
    %433 = vector.broadcast %432 : vector<10x1xf32> to vector<10x32xf32>
    %434 = arith.subf %426, %433 : vector<10x32xf32>
    %435 = arith.mulf %434, %434 : vector<10x32xf32>
    %cst_166 = arith.constant dense<0.000000e+00> : vector<10xf32>
    %436 = vector.multi_reduction <add>, %435, %cst_166 [1] : vector<10x32xf32> to vector<10xf32>
    %437 = vector.shape_cast %436 : vector<10xf32> to vector<10x1xf32>
    %cst_167 = arith.constant 3.200000e+01 : f32
    %438 = vector.broadcast %cst_167 : f32 to vector<10x1xf32>
    %439 = arith.divf %437, %438 : vector<10x1xf32>
    %440 = vector.broadcast %432 : vector<10x1xf32> to vector<10x32xf32>
    %441 = arith.subf %426, %440 : vector<10x32xf32>
    %cst_168 = arith.constant 9.99999974E-6 : f32
    %442 = vector.broadcast %cst_168 : f32 to vector<10x1xf32>
    %443 = arith.addf %439, %442 : vector<10x1xf32>
    %444 = math.rsqrt %443 : vector<10x1xf32>
    %445 = vector.broadcast %444 : vector<10x1xf32> to vector<10x32xf32>
    %446 = arith.mulf %441, %445 : vector<10x32xf32>
    %447 = vector.broadcast %427 : vector<1x32xf32> to vector<10x32xf32>
    %448 = arith.mulf %446, %447 : vector<10x32xf32>
    %449 = vector.broadcast %428 : vector<1x32xf32> to vector<10x32xf32>
    %450 = arith.addf %448, %449 : vector<10x32xf32>
    %c1_169 = arith.constant 1 : index
    %c0_170 = arith.constant 0 : index
    %c0_171 = arith.constant 0 : index
    %451 = vector.load %arg14[%c1_169, %c0_170, %c0_171] : memref<2x32x128xf32, #tpu.memory_space<vmem>>, vector<1x32x128xf32>
    %452 = vector.shape_cast %451 : vector<1x32x128xf32> to vector<32x128xf32>
    %cst_172 = arith.constant dense<0.000000e+00> : vector<10x128xf32>
    %453 = tpu.matmul %450, %452, %cst_172 {dimension_numbers = #tpu.dot_dimension_numbers<[1], [0], [0], [1], [0, 0, 1, 1], [], []>} : vector<10x32xf32>, vector<32x128xf32>, vector<10x128xf32> -> vector<10x128xf32>
    %c1_173 = arith.constant 1 : index
    %c0_174 = arith.constant 0 : index
    %454 = vector.load %arg15[%c1_173, %c0_174] : memref<2x128xf32, #tpu.memory_space<vmem>>, vector<1x128xf32>
    %455 = vector.broadcast %454 : vector<1x128xf32> to vector<10x128xf32>
    %456 = arith.addf %453, %455 : vector<10x128xf32>
    %cst_175 = arith.constant 1.702000e+00 : f32
    %457 = vector.broadcast %cst_175 : f32 to vector<10x128xf32>
    %458 = arith.mulf %457, %456 : vector<10x128xf32>
    %459 = arith.negf %458 : vector<10x128xf32>
    %460 = math.exp %459 : vector<10x128xf32>
    %cst_176 = arith.constant 1.000000e+00 : f32
    %461 = vector.broadcast %cst_176 : f32 to vector<10x128xf32>
    %462 = arith.addf %461, %460 : vector<10x128xf32>
    %463 = arith.divf %461, %462 : vector<10x128xf32>
    %464 = arith.mulf %456, %463 : vector<10x128xf32>
    %c1_177 = arith.constant 1 : index
    %c0_178 = arith.constant 0 : index
    %c0_179 = arith.constant 0 : index
    %465 = vector.load %arg16[%c1_177, %c0_178, %c0_179] : memref<2x128x32xf32, #tpu.memory_space<vmem>>, vector<1x128x32xf32>
    %466 = vector.shape_cast %465 : vector<1x128x32xf32> to vector<128x32xf32>
    %cst_180 = arith.constant dense<0.000000e+00> : vector<10x32xf32>
    %467 = tpu.matmul %464, %466, %cst_180 {dimension_numbers = #tpu.dot_dimension_numbers<[1], [0], [0], [1], [0, 0, 1, 1], [], []>} : vector<10x128xf32>, vector<128x32xf32>, vector<10x32xf32> -> vector<10x32xf32>
    %c1_181 = arith.constant 1 : index
    %c0_182 = arith.constant 0 : index
    %468 = vector.load %arg17[%c1_181, %c0_182] : memref<2x32xf32, #tpu.memory_space<vmem>>, vector<1x32xf32>
    %469 = vector.broadcast %468 : vector<1x32xf32> to vector<10x32xf32>
    %470 = arith.addf %467, %469 : vector<10x32xf32>
    %471 = arith.addf %426, %470 : vector<10x32xf32>
    %472 = vector.extract_strided_slice %471 {offsets = [0, 0], sizes = [1, 32], strides = [1, 1]} : vector<10x32xf32> to vector<1x32xf32>
    %473 = vector.extract_strided_slice %471 {offsets = [5, 0], sizes = [1, 32], strides = [1, 1]} : vector<10x32xf32> to vector<1x32xf32>
    %474 = tpu.concatenate %472, %473 in 0 : vector<1x32xf32>, vector<1x32xf32> -> vector<2x32xf32>
    %c0_183 = arith.constant 0 : index
    %c0_184 = arith.constant 0 : index
    %475 = vector.load %arg18[%c0_183, %c0_184] : memref<1x32xf32, #tpu.memory_space<vmem>>, vector<1x32xf32>
    %c0_185 = arith.constant 0 : index
    %c0_186 = arith.constant 0 : index
    %476 = vector.load %arg19[%c0_185, %c0_186] : memref<1x32xf32, #tpu.memory_space<vmem>>, vector<1x32xf32>
    %cst_187 = arith.constant dense<0.000000e+00> : vector<2xf32>
    %477 = vector.multi_reduction <add>, %474, %cst_187 [1] : vector<2x32xf32> to vector<2xf32>
    %478 = vector.shape_cast %477 : vector<2xf32> to vector<2x1xf32>
    %cst_188 = arith.constant 3.200000e+01 : f32
    %479 = vector.broadcast %cst_188 : f32 to vector<2x1xf32>
    %480 = arith.divf %478, %479 : vector<2x1xf32>
    %481 = vector.broadcast %480 : vector<2x1xf32> to vector<2x32xf32>
    %482 = arith.subf %474, %481 : vector<2x32xf32>
    %483 = arith.mulf %482, %482 : vector<2x32xf32>
    %cst_189 = arith.constant dense<0.000000e+00> : vector<2xf32>
    %484 = vector.multi_reduction <add>, %483, %cst_189 [1] : vector<2x32xf32> to vector<2xf32>
    %485 = vector.shape_cast %484 : vector<2xf32> to vector<2x1xf32>
    %cst_190 = arith.constant 3.200000e+01 : f32
    %486 = vector.broadcast %cst_190 : f32 to vector<2x1xf32>
    %487 = arith.divf %485, %486 : vector<2x1xf32>
    %488 = vector.broadcast %480 : vector<2x1xf32> to vector<2x32xf32>
    %489 = arith.subf %474, %488 : vector<2x32xf32>
    %cst_191 = arith.constant 9.99999974E-6 : f32
    %490 = vector.broadcast %cst_191 : f32 to vector<2x1xf32>
    %491 = arith.addf %487, %490 : vector<2x1xf32>
    %492 = math.rsqrt %491 : vector<2x1xf32>
    %493 = vector.broadcast %492 : vector<2x1xf32> to vector<2x32xf32>
    %494 = arith.mulf %489, %493 : vector<2x32xf32>
    %495 = vector.broadcast %475 : vector<1x32xf32> to vector<2x32xf32>
    %496 = arith.mulf %494, %495 : vector<2x32xf32>
    %497 = vector.broadcast %476 : vector<1x32xf32> to vector<2x32xf32>
    %498 = arith.addf %496, %497 : vector<2x32xf32>
    %c0_192 = arith.constant 0 : index
    %c0_193 = arith.constant 0 : index
    %499 = vector.load %arg20[%c0_192, %c0_193] : memref<32x32xf32, #tpu.memory_space<vmem>>, vector<32x32xf32>
    %cst_194 = arith.constant dense<0.000000e+00> : vector<2x32xf32>
    %500 = tpu.matmul %498, %499, %cst_194 {dimension_numbers = #tpu.dot_dimension_numbers<[1], [0], [0], [1], [0, 0, 1, 1], [], []>} : vector<2x32xf32>, vector<32x32xf32>, vector<2x32xf32> -> vector<2x32xf32>
    %501 = arith.mulf %500, %500 : vector<2x32xf32>
    %cst_195 = arith.constant dense<0.000000e+00> : vector<2xf32>
    %502 = vector.multi_reduction <add>, %501, %cst_195 [1] : vector<2x32xf32> to vector<2xf32>
    %503 = vector.shape_cast %502 : vector<2xf32> to vector<2x1xf32>
    %504 = math.rsqrt %503 : vector<2x1xf32>
    %505 = vector.broadcast %504 : vector<2x1xf32> to vector<2x32xf32>
    %506 = arith.mulf %500, %505 : vector<2x32xf32>
    %c0_196 = arith.constant 0 : index
    %c0_197 = arith.constant 0 : index
    %507 = vector.load %arg21[%c0_196, %c0_197] : memref<2x32xf32, #tpu.memory_space<vmem>>, vector<2x32xf32>
    tpu.vector_store %arg21[%c0_196, %c0_197], %506 {strides = array<i32>} : memref<2x32xf32, #tpu.memory_space<vmem>>, vector<2x32xf32>,
    return
  }
}

</mosaic_0001>

<bundles_post_ra>
// kernel: custom_clip_forward.1
= control target key start
LH: loop header
LB: loop body
LE: loop exit
PB: predicated region body
PF: predicated region fallthrough
CT: control target
= control target key end

     0   :  { %s5843_s0 = inlined_call_operand.vmem [shape: f32[8,192], index: 0, kind: input, shape index: {}]   ;;  %s5844_s1 = inlined_call_operand.vmem [shape: f32[192,32], index: 1, kind: input, shape index: {}]   ;;  %s5845_s2 = inlined_call_operand.vmem [shape: f32[1,32], index: 2, kind: input, shape index: {}]   ;;  %s5846_s3 = inlined_call_operand.vmem [shape: f32[5,32], index: 3, kind: input, shape index: {}]   ;;  %s5847_s4 = inlined_call_operand.vmem [shape: f32[1,32], index: 4, kind: input, shape index: {}]   ;;  %s5848_s5 = inlined_call_operand.vmem [shape: f32[1,32], index: 5, kind: input, shape index: {}]   ;;  %s5849_s6 = inlined_call_operand.vmem [shape: f32[2,32], index: 6, kind: input, shape index: {}]   ;;  %s5850_s7 = inlined_call_operand.vmem [shape: f32[2,32], index: 7, kind: input, shape index: {}]   ;;  %s5851_s8 = inlined_call_operand.vmem [shape: f32[2,32,96], index: 8, kind: input, shape index: {}]   ;;  %s5852_s9 = inlined_call_operand.vmem [shape: f32[2,96], index: 9, kind: input, shape index: {}]   ;;  %s5853_s10 = inlined_call_operand.vmem [shape: f32[2,32,32], index: 10, kind: input, shape index: {}]   ;;  %s5854_s11 = inlined_call_operand.vmem [shape: f32[2,32], index: 11, kind: input, shape index: {}]   ;;  %s5855_s12 = inlined_call_operand.vmem [shape: f32[2,32], index: 12, kind: input, shape index: {}]   ;;  %s5856_s13 = inlined_call_operand.vmem [shape: f32[2,32], index: 13, kind: input, shape index: {}]   ;;  %s5857_s14 = inlined_call_operand.vmem [shape: f32[2,32,128], index: 14, kind: input, shape index: {}]   ;;  %s5858_s15 = inlined_call_operand.vmem [shape: f32[2,128], index: 15, kind: input, shape index: {}]   ;;  %s5859_s16 = inlined_call_operand.vmem [shape: f32[2,128,32], index: 16, kind: input, shape index: {}]   ;;  %s5860_s17 = inlined_call_operand.vmem [shape: f32[2,32], index: 17, kind: input, shape index: {}]   ;;  %s5861_s18 = inlined_call_operand.vmem [shape: f32[1,32], index: 18, kind: input, shape index: {}]   ;;  %s5862_s19 = inlined_call_operand.vmem [shape: f32[1,32], index: 19, kind: input, shape index: {}]   ;;  %s5863_s20 = inlined_call_operand.vmem [shape: f32[32,32], index: 20, kind: input, shape index: {}]   ;;  %s5864_s21 = inlined_call_operand.hbm [shape: f32[2,32], index: 21, kind: output, shape index: {}]  }
   0x1   :  { %5881 = sst [smem:[#allocation5_spill]] %s5843_s0 }
   0x2   :  { %5882 = sst [smem:[#allocation6_spill]] %s5844_s1 }
   0x3   :  { %5883 = sst [smem:[#allocation7_spill]] %s5845_s2 }
   0x4   :  { %5884 = sst [smem:[#allocation8_spill]] %s5846_s3 }
   0x5   :  { %5885 = sst [smem:[#allocation9_spill]] %s5847_s4 }
   0x6   :  { %5886 = sst [smem:[#allocation10_spill]] %s5848_s5 }
   0x7   :  { %s5887_s26 = sld [smem:[#allocation6_spill]]  ;;  %v4930_v3 = vmov 0.0|0.0   ;;  %vm95_vm0 = vcmask 523264   ;;  %s5888_s28 = sld [smem:[#allocation5_spill]] }
   0x8   :  { %4630 = vmatprep.subr.bf16.mxu0 %v4930_v3 }
   0xd   :  { %v71_v0 = vld [vmem:[%s5887_s26] sm:$0xff]  ;;  %v72_v1 = vld [vmem:[%s5887_s26 + $0x8] sm:$0xff]  ;;  %v73_v2 = vld [vmem:[%s5887_s26 + $0x10] sm:$0xff] }
   0xe   :  { %v4631_v4 = vpack.c.bf16 %v72_v1, %v71_v0  ;;  %v74_v5 = vld [vmem:[%s5887_s26 + $0x18] sm:$0xff]  ;;  %v75_v7 = vld [vmem:[%s5887_s26 + $0x20] sm:$0xff]  ;;  %v76_v8 = vld [vmem:[%s5887_s26 + $0x28] sm:$0xff] }
   0xf   :  { %v4634_v6 = vpack.c.bf16 %v74_v5, %v73_v2  ;;  %v4637_v9 = vpack.c.bf16 %v76_v8, %v75_v7  ;;  %v77_v10 = vld [vmem:[%s5887_s26 + $0x30] sm:$0xff]  ;;  %v78_v11 = vld [vmem:[%s5887_s26 + $0x38] sm:$0xff]  ;;  %v70_v12 = vld [vmem:[%s5888_s28 + $0x8] sm:$0xff] }
  0x10   :  { %4632 = vmatpush1.bf16.msra.mxu0 %v4631_v4 }
  0x11   :  { %4633 = vmatprep.subr.bf16.mxu0 %v4930_v3 }
  0x14   :  { %4635 = vmatpush1.bf16.msra.mxu0 %v4634_v6 }
  0x15   :  { %4636 = vmatprep.subr.bf16.mxu0 %v4930_v3 }
  0x16   :  { %26 = vsyncpa [#allocation3], 0  ;;  %4052 = vmatprep.mubr.msk.f32.mxu0 %vm95_vm0, %v70_v12  ;;  %v4640_v13 = vpack.c.bf16 %v78_v11, %v77_v10  ;;  %v79_v14 = vld [vmem:[%s5887_s26 + $0x40] sm:$0xff]  ;;  %v80_v15 = vld [vmem:[%s5887_s26 + $0x48] sm:$0xff]  ;;  %v175_v39 = vlaneseq  ;;  %s5889_s25 = sld [smem:[#allocation7_spill]]  ;;  %vm182_vm1 = vcmask 1040384  }
  0x17   :  { %v4643_v16 = vpack.c.bf16 %v80_v15, %v79_v14  ;;  %v81_v17 = vld [vmem:[%s5887_s26 + $0x50] sm:$0xff]  ;;  %v82_v18 = vld [vmem:[%s5887_s26 + $0x58] sm:$0xff]  ;;  %v83_v20 = vld [vmem:[%s5887_s26 + $0x60] sm:$0xff]  ;;  %vm184_vm2 = vcmask 1044480   ;;  %vm186_vm3 = vcmask 1045504   ;;  %vm196_vm4 = vcmask 261120  }
  0x18   :  { %4638 = vmatpush1.bf16.msra.mxu0 %v4637_v9  ;;  %v4646_v19 = vpack.c.bf16 %v82_v18, %v81_v17  ;;  %v84_v21 = vld [vmem:[%s5887_s26 + $0x68] sm:$0xff]  ;;  %v85_v23 = vld [vmem:[%s5887_s26 + $0x70] sm:$0xff]  ;;  %v86_v24 = vld [vmem:[%s5887_s26 + $0x78] sm:$0xff]  ;;  %v176_v40 = vshrl.u32 %v175_v39, 7  ;;  %vm200_vm5 = vcmask 254976   ;;  %s5891_s0 = sld [smem:[#allocation9_spill]] }
  0x19   :  { %4639 = vmatprep.subr.bf16.mxu0 %v4930_v3  ;;  %v4649_v22 = vpack.c.bf16 %v84_v21, %v83_v20  ;;  %v4652_v25 = vpack.c.bf16 %v86_v24, %v85_v23  ;;  %v87_v26 = vld [vmem:[%s5887_s26 + $0x80] sm:$0xff]  ;;  %v88_v27 = vld [vmem:[%s5887_s26 + $0x88] sm:$0xff]  ;;  %v89_v29 = vld [vmem:[%s5887_s26 + $0x90] sm:$0xff]  ;;  %s5892_s5 = sld [smem:[#allocation10_spill]]  ;;  %vm4932_vm6 = vmmov 0   ;;  %s4934_s22 = smov 88  }
  0x1a   :  { %v4655_v28 = vpack.c.bf16 %v88_v27, %v87_v26  ;;  %v90_v30 = vld [vmem:[%s5887_s26 + $0x98] sm:$0xff]  ;;  %v91_v32 = vld [vmem:[%s5887_s26 + $0xa0] sm:$0xff]  ;;  %v92_v33 = vld [vmem:[%s5887_s26 + $0xa8] sm:$0xff]  ;;  %v177_v41 = vsub.s32 0, %v176_v40  ;;  %vm374_vm7 = vcmask 64512   ;;  %vm450_vm8 = vcmask 36864  }
  0x1b   :  { %v4658_v31 = vpack.c.bf16 %v90_v30, %v89_v29  ;;  %v4661_v34 = vpack.c.bf16 %v92_v33, %v91_v32  ;;  %v93_v35 = vld [vmem:[%s5887_s26 + $0xb0] sm:$0xff]  ;;  %v94_v36 = vld [vmem:[%s5887_s26 + $0xb8] sm:$0xff]  ;;  %v69_v38 = vld [vmem:[%s5888_s28] sm:$0xff]  ;;  %s5890_s26 = sld [smem:[#allocation8_spill]]  ;;  %s4935_s23 = smov 64   ;;  %vm464_vm9 = vcmask 39936  }
  0x1c   :  { %4641 = vmatpush1.bf16.msra.mxu0 %v4640_v13  ;;  %v4664_v37 = vpack.c.bf16 %v94_v36, %v93_v35  ;;  %v169_v42 = vld [vmem:[%s5889_s25] sm:$0x1]  ;;  %v283_v35 = vld [vmem:[%s5851_s8 + $0x10] sm:$0xff]  ;;  %s4936_s1 = smov 120   ;;  %s5875_s24 = smov 56   ;;  %vm1059_vm10 = vcmask 1042432  }
  0x1d   :  { %4642 = vmatprep.subr.bf16.mxu0 %v4930_v3  ;;  %v178_v45 = vrot.slane %v169_v42, %v177_v41  ;;  %v281_v33 = vld [vmem:[%s5851_s8] sm:$0xff]  ;;  %s5873_s2 = smov 112   ;;  %s4939_s25 = smov 80   ;;  %vm1056_vm11 = vcmask 195584   ;;  %vm1054_vm12 = vcmask 130048  }
  0x1e   :  { %v4053_v12 = vld [vmem:[%s5891_s0] ss:$0 sm:$0xff]  ;;  %s5877_s27 = smov 72   ;;  %s5871_s3 = smov 104  }
  0x1f   :  { %v4054_v14 = vld [vmem:[%s5892_s5] ss:$0 sm:$0xff]  ;;  %s4933_s5 = smov 96   ;;  %s5869_s28 = smov 40  }
  0x20   :  { %4644 = vmatpush1.bf16.msra.mxu0 %v4643_v16  ;;  %s4944_s29 = smov 8   ;;  %s4945_s0 = smov 16  }
  0x21   :  { %4645 = vmatprep.subr.bf16.mxu0 %v4930_v3  ;;  %v170_v43 = vld [vmem:[%s5890_s26] sm:$0x1f]  ;;  %s5867_s26 = smov 48   ;;  %s5895_s4 = smov 112  }
  0x22   :  { %v189_v48 = vrot.slane %v170_v43, 3  ;;  %s5896_s30 = smov 104  }
  0x24   :  { %4647 = vmatpush1.bf16.msra.mxu0 %v4646_v19  ;;  %v191_v51 = vsel %vm184_vm2, %v170_v43, %v189_v48 }
  0x25   :  { %4648 = vmatprep.subr.bf16.mxu0 %v4930_v3 }
  0x28   :  { %4650 = vmatpush1.bf16.msra.mxu0 %v4649_v22 }
  0x29   :  { %4651 = vmatprep.subr.bf16.mxu0 %v4930_v3 }
  0x2c   :  { %4653 = vmatpush1.bf16.msra.mxu0 %v4652_v25 }
  0x2d   :  { %4654 = vmatprep.subr.bf16.mxu0 %v4930_v3 }
  0x30   :  { %4656 = vmatpush1.bf16.msra.mxu0 %v4655_v28 }
  0x31   :  { %4657 = vmatprep.subr.bf16.mxu0 %v4930_v3 }
  0x34   :  { %4659 = vmatpush1.bf16.msra.mxu0 %v4658_v31 }
  0x35   :  { %4660 = vmatprep.subr.bf16.mxu0 %v4930_v3 }
  0x38   :  { %4662 = vmatpush1.bf16.msra.mxu0 %v4661_v34  ;;  %v282_v34 = vld [vmem:[%s5851_s8 + $0x8] sm:$0xff] }
  0x39   :  { %4663 = vmatprep.subr.bf16.mxu0 %v4930_v3  ;;  %v4666_v36 = vpack.c.bf16 %v282_v34, %v281_v33 }
  0x3b   :  { %4667 = vmatprep.subr.bf16.mxu1 %v4666_v36 }
  0x3c   :  { %4665 = vmatpush1.bf16.msra.mxu0 %v4664_v37  ;;  %v284_v37 = vld [vmem:[%s5851_s8 + $0x18] sm:$0xff]  ;;  %4669 = vmatpush3.bf16.msra.mxu1 %v4666_v36 }
  0x3f   :  { %164 = vmatmul.mubr.f32.vlgmr.msra.gmra.mrb[0].mxu0 %v69_v38  ;;  %v4670_v38 = vpack.c.bf16 %v284_v37, %v283_v35 }
  0x41   :  { %4671 = vmatprep.subr.bf16.mxu1 %v4670_v38 }
  0x42   :  { %4673 = vmatpush3.bf16.msra.mxu1 %v4670_v38 }
 0x112   :  { %v165_v44 = vpop.f32.mrb[0].mxu0 }
 0x113   :  { %v172_v46 = vrot.slane %v165_v44, 7  ;;  %v167_v47 = vpop.f32.mrb[1].mxu0  ;;  %v180_v49 = vrot.slane %v165_v44, 6 }
 0x115   :  { %v183_v50 = vsel %vm182_vm1, %v169_v42, %v172_v46  ;;  %v193_v56 = vadd.f32 %v189_v48, %v180_v49  ;;  %v4055_v46 = vld [vmem:[%s5849_s6] ss:$0 sm:$0xff] }
 0x116   :  { %v185_v52 = vsel %vm184_vm2, %v183_v50, %v178_v45  ;;  %v4056_v48 = vld [vmem:[%s5850_s7] ss:$0 sm:$0xff] }
 0x117   :  { %v187_v53 = vsel %vm186_vm3, %v185_v52, %v180_v49  ;;  %v201_v57 = vsel %vm200_vm5, %v193_v56, 0.0 }
 0x118   :  { %v192_v54 = vadd.f32 %v191_v51, %v187_v53 }
 0x11a   :  { %v197_v55 = vsel %vm196_vm4, %v192_v54, 0.0 }
 0x11b   :  { %198 = vadd.xlane.f32.xlu0 %v197_v55  ;;  %v4931_v55 = vmov 0.0  }
 0x11c   :  { %4334 = vmatprep.subr.mxu1 %v4931_v55  ;;  %4394 = vmatprep.subr.mxu0 %v4931_v55 }
 0x11d   :  { %4396 = vmatprep.mubr.msk.f32.mxu0 %vm4932_vm6, %v4931_v55 }
 0x11f   :  { %202 = vadd.xlane.f32.xlu0 %v201_v57 }
 0x1a8   :  { %v199_v58 = vpop.xlane.xlu0 %198 }
 0x1a9   :  { %v205_v59 = vmul.f32 0.03125, %v199_v58 }
 0x1ab   :  { %v207_v60 = vsub.f32 %v192_v54, %v205_v59 }
 0x1ac   :  { %v203_v61 = vpop.xlane.xlu0 %202 }
 0x1ad   :  { %v206_v62 = vmul.f32 0.03125, %v203_v61  ;;  %v209_v63 = vmul.f32 %v207_v60, %v207_v60 }
 0x1af   :  { %v208_v0 = vsub.f32 %v193_v56, %v206_v62  ;;  %v211_v1 = vsel %vm196_vm4, %v209_v63, 0.0  ;;  %v4057_v56 = vld [vmem:[%s5852_s9] ss:$0 sm:$0xff] }
 0x1b0   :  { %212 = vadd.xlane.f32.xlu1 %v211_v1 }
 0x1b1   :  { %v210_v2 = vmul.f32 %v208_v0, %v208_v0 }
 0x1b3   :  { %v214_v4 = vsel %vm200_vm5, %v210_v2, 0.0 }
 0x1b4   :  { %215 = vadd.xlane.f32.xlu1 %v214_v4 }
 0x23d   :  { %v213_v5 = vpop.xlane.xlu1 %212 }
 0x23e   :  { %v217_v6 = vmul.f32 0.03125, %v213_v5 }
 0x240   :  { %v219_v7 = vadd.f32 1e-05, %v217_v6 }
 0x241   :  { %v216_v8 = vpop.xlane.xlu1 %215 }
 0x242   :  { %4802 = vrsqrt.f32 %v219_v7  ;;  %v218_v9 = vmul.f32 0.03125, %v216_v8 }
 0x244   :  { %v220_v10 = vadd.f32 1e-05, %v218_v9 }
 0x246   :  { %4804 = vrsqrt.f32 %v220_v10 }
 0x24c   :  { %v4803_v11 = vpop.eup %4802 }
 0x24d   :  { %v223_v13 = vmul.f32 %v4803_v11, %v207_v60 }
 0x24f   :  { %v231_v15 = vmul.f32 %v4053_v12, %v223_v13 }
 0x250   :  { %v4805_v16 = vpop.eup %4804 }
 0x251   :  { %v5167_v17 = vadd.f32 %v4054_v14, %v231_v15  ;;  %v224_v18 = vmul.f32 %v4805_v16, %v208_v0 }
 0x253   :  { %v243_v19 = vsel %vm196_vm4, %v5167_v17, 0.0  ;;  %v232_v20 = vmul.f32 %v4053_v12, %v224_v18 }
 0x254   :  { %244 = vadd.xlane.f32.xlu0 %v243_v19 }
 0x255   :  { %v5171_v21 = vadd.f32 %v4054_v14, %v232_v20 }
 0x257   :  { %v246_v22 = vsel %vm200_vm5, %v5171_v21, 0.0 }
 0x258   :  { %247 = vadd.xlane.f32.xlu1 %v246_v22 }
 0x2e1   :  { %v245_v23 = vpop.xlane.xlu0 %244 }
 0x2e2   :  { %v249_v24 = vmul.f32 0.03125, %v245_v23 }
 0x2e4   :  { %v251_v25 = vsub.f32 %v5167_v17, %v249_v24 }
 0x2e5   :  { %v248_v26 = vpop.xlane.xlu1 %247 }
 0x2e6   :  { %v250_v27 = vmul.f32 0.03125, %v248_v26  ;;  %v253_v28 = vmul.f32 %v251_v25, %v251_v25 }
 0x2e8   :  { %v252_v29 = vsub.f32 %v5171_v21, %v250_v27  ;;  %v255_v30 = vsel %vm196_vm4, %v253_v28, 0.0 }
 0x2e9   :  { %256 = vadd.xlane.f32.xlu0 %v255_v30 }
 0x2ea   :  { %v254_v31 = vmul.f32 %v252_v29, %v252_v29 }
 0x2ec   :  { %v258_v32 = vsel %vm200_vm5, %v254_v31, 0.0 }
 0x2ed   :  { %259 = vadd.xlane.f32.xlu1 %v258_v32 }
 0x376   :  { %v257_v39 = vpop.xlane.xlu0 %256 }
 0x377   :  { %v261_v40 = vmul.f32 0.03125, %v257_v39 }
 0x379   :  { %v263_v41 = vadd.f32 1e-05, %v261_v40 }
 0x37a   :  { %v260_v42 = vpop.xlane.xlu1 %259 }
 0x37b   :  { %4806 = vrsqrt.f32 %v263_v41  ;;  %v262_v43 = vmul.f32 0.03125, %v260_v42 }
 0x37d   :  { %v264_v44 = vadd.f32 1e-05, %v262_v43 }
 0x37f   :  { %4808 = vrsqrt.f32 %v264_v44 }
 0x385   :  { %v4807_v45 = vpop.eup %4806 }
 0x386   :  { %v267_v47 = vmul.f32 %v4807_v45, %v251_v25 }
 0x388   :  { %v273_v49 = vmul.f32 %v4055_v46, %v267_v47 }
 0x389   :  { %v4809_v50 = vpop.eup %4808 }
 0x38a   :  { %v268_v51 = vmul.f32 %v4809_v50, %v252_v29  ;;  %v279_v52 = vadd.f32 %v4056_v48, %v273_v49 }
 0x38c   :  { %v274_v53 = vmul.f32 %v4055_v46, %v268_v51  ;;  %4331 = vmatprep.mubr.msk.f32.mxu1 %vm196_vm4, %v279_v52 }
 0x38e   :  { %v280_v54 = vadd.f32 %v4056_v48, %v274_v53 }
 0x390   :  { %4332 = vmatmul.mubr.msk.f32.vlgmr.msra.gmra.mrb[0].mxu1 %vm196_vm4, %v280_v54 }
 0x391   :  { %4336 = vmatprep.mubr.msk.f32.mxu1 %vm4932_vm6, %v4931_v55 }
 0x463   :  { %v4333_v57 = vpop.f32.mrb[0].mxu1 }
 0x464   :  { %v5208_v58 = vadd.f32 %v4333_v57, %v4057_v56  ;;  %v362_v59 = vpop.f32.mrb[1].mxu1 }
 0x465   :  { %v5210_v60 = vadd.f32 %v4057_v56, %v362_v59 }
 0x467   :  { %372 = vrot.lane.b32.xlu0 %v5210_v60, %s4933_s5 }
 0x46b   :  { %542 = vrot.lane.b32.xlu0 %v5210_v60, %s4934_s22 }
 0x4d9   :  { %v373_v61 = vpop.permute.xlu0 %372 }
 0x4da   :  { %4335 = vmatpush3.xpose.msk.msra.mxu1 %vm374_vm7, %v373_v61 }
 0x4db   :  { %4339 = vmatprep.subr.mxu1 %v4931_v55 }
 0x4dd   :  { %4337 = vmatmul.mubr.msk.f32.vlgmr.msra.gmra.mrb[2].mxu1 %vm374_vm7, %v5210_v60  ;;  %v543_v12 = vpop.permute.xlu0 %542 }
 0x4de   :  { %4341 = vmatprep.mubr.msk.f32.mxu1 %vm4932_vm6, %v4931_v55 }
 0x5b0   :  { %v445_v62 = vpop.f32.mrb[2].mxu1 }
 0x5b1   :  { %v449_v63 = vmul.f32 0.35355338, %v445_v62  ;;  %v4338_v0 = vpop.f32.mrb[3].mxu1 }
 0x5b3   :  { %v451_v1 = vsel %vm450_vm8, %v449_v63, -inf }
 0x5b4   :  { %452 = vmax.xlane.f32.xlu1 %v451_v1  ;;  %v1061_v1 = vrot.slane %v5208_v58, 5 }
 0x5c5   :  { %462 = vrot.lane.b32.xlu1 %v5210_v60, %s4935_s23 }
 0x641   :  { %v453_v2 = vpop.xlane.xlu1 %452 }
 0x642   :  { %v454_v4 = vsub.f32 %v449_v63, %v453_v2  ;;  %v1060_v2 = vrot.slane %v5210_v60, 5 }
 0x644   :  { %v455_v5 = vmul.f32 1.442695, %v454_v4  ;;  %v5289_v4 = vsel %vm1059_vm10, %v1060_v2, %v1061_v1 }
 0x645   :  { %v463_v6 = vpop.permute.xlu1 %462 }
 0x646   :  { %4810 = vpow2.f32 %v455_v5  ;;  %4340 = vmatpush3.msk.msra.mxu1 %vm184_vm2, %v463_v6 }
 0x647   :  { %4344 = vmatprep.subr.mxu1 %v4931_v55 }
 0x650   :  { %v4811_v7 = vpop.eup %4810 }
 0x651   :  { %v457_v8 = vsel %vm450_vm8, %v4811_v7, 0.0 }
 0x652   :  { %458 = vadd.xlane.f32.xlu1 %v457_v8 }
 0x663   :  { %540 = vrot.lane.b32.xlu1 %v5210_v60, %s4936_s1 }
 0x6df   :  { %v459_v9 = vpop.xlane.xlu1 %458 }
 0x6e0   :  { %4812 = vrcp.f32 %v459_v9 }
 0x6e3   :  { %v541_v13 = vpop.permute.xlu1 %540 }
 0x6ea   :  { %v4813_v10 = vpop.eup %4812 }
 0x6eb   :  { %v461_v11 = vmul.f32 %v4813_v10, %v4811_v7 }
 0x6ed   :  { %4342 = vmatmul.mubr.msk.f32.vlgmr.msra.gmra.mrb[4].mxu1 %vm464_vm9, %v461_v11 }
 0x6ee   :  { %4345 = vmatpush3.xpose.msk.msra.mxu1 %vm374_vm7, %v543_v12  ;;  %4346 = vmatprep.mubr.msk.f32.mxu1 %vm4932_vm6, %v4931_v55 }
 0x6ef   :  { %4349 = vmatprep.subr.mxu1 %v4931_v55 }
 0x6f1   :  { %4347 = vmatmul.mubr.msk.f32.vlgmr.msra.gmra.mrb[6].mxu1 %vm374_vm7, %v541_v13 }
 0x6f2   :  { %4351 = vmatprep.mubr.msk.f32.mxu1 %vm4932_vm6, %v4931_v55 }
 0x7c0   :  { %v5238_v14 = vpop.f32.mrb[4].mxu1 }
 0x7c1   :  { %v4343_v15 = vpop.f32.mrb[5].mxu1 }
 0x7c4   :  { %v614_v16 = vpop.f32.mrb[6].mxu1 }
 0x7c5   :  { %v618_v18 = vmul.f32 0.35355338, %v614_v16  ;;  %v4348_v19 = vpop.f32.mrb[7].mxu1 }
 0x7c7   :  { %v619_v20 = vsel %vm450_vm8, %v618_v18, -inf }
 0x7c8   :  { %620 = vmax.xlane.f32.xlu0 %v619_v20 }
 0x7de   :  { %630 = vrot.lane.b32.xlu0 %v5210_v60, %s5875_s24 }
 0x7e2   :  { %707 = vrot.lane.b32.xlu0 %v5210_v60, %s5873_s2 }
 0x855   :  { %v621_v22 = vpop.xlane.xlu0 %620 }
 0x856   :  { %v622_v23 = vsub.f32 %v618_v18, %v621_v22 }
 0x858   :  { %v623_v24 = vmul.f32 1.442695, %v622_v23 }
 0x859   :  { %v631_v25 = vpop.permute.xlu0 %630 }
 0x85a   :  { %4814 = vpow2.f32 %v623_v24  ;;  %4350 = vmatpush3.msk.msra.mxu1 %vm184_vm2, %v631_v25 }
 0x85b   :  { %4354 = vmatprep.subr.mxu1 %v4931_v55 }
 0x85d   :  { %v708_v32 = vpop.permute.xlu0 %707 }
 0x864   :  { %v4815_v26 = vpop.eup %4814 }
 0x865   :  { %v625_v27 = vsel %vm450_vm8, %v4815_v26, 0.0 }
 0x866   :  { %626 = vadd.xlane.f32.xlu1 %v625_v27 }
 0x877   :  { %709 = vrot.lane.b32.xlu1 %v5210_v60, %s4939_s25 }
 0x8f3   :  { %v627_v28 = vpop.xlane.xlu1 %626 }
 0x8f4   :  { %4816 = vrcp.f32 %v627_v28 }
 0x8f7   :  { %v710_v31 = vpop.permute.xlu1 %709 }
 0x8fe   :  { %v4817_v29 = vpop.eup %4816 }
 0x8ff   :  { %v629_v30 = vmul.f32 %v4817_v29, %v4815_v26 }
 0x901   :  { %4352 = vmatmul.mubr.msk.f32.vlgmr.msra.gmra.mrb[8].mxu1 %vm464_vm9, %v629_v30 }
 0x902   :  { %4355 = vmatpush3.xpose.msk.msra.mxu1 %vm374_vm7, %v710_v31  ;;  %4356 = vmatprep.mubr.msk.f32.mxu1 %vm4932_vm6, %v4931_v55 }
 0x903   :  { %4359 = vmatprep.subr.mxu1 %v4931_v55 }
 0x905   :  { %4357 = vmatmul.mubr.msk.f32.vlgmr.msra.gmra.mrb[10].mxu1 %vm374_vm7, %v708_v32 }
 0x906   :  { %4361 = vmatprep.mubr.msk.f32.mxu1 %vm4932_vm6, %v4931_v55 }
 0x9d4   :  { %v5258_v33 = vpop.f32.mrb[8].mxu1 }
 0x9d5   :  { %v4353_v34 = vpop.f32.mrb[9].mxu1 }
 0x9d8   :  { %v781_v35 = vpop.f32.mrb[10].mxu1 }
 0x9d9   :  { %v785_v36 = vmul.f32 0.35355338, %v781_v35  ;;  %v4358_v37 = vpop.f32.mrb[11].mxu1 }
 0x9db   :  { %v786_v38 = vsel %vm450_vm8, %v785_v36, -inf }
 0x9dc   :  { %787 = vmax.xlane.f32.xlu1 %v786_v38 }
 0x9ed   :  { %876 = vrot.lane.b32.xlu1 %v5210_v60, %s5877_s27 }
 0x9f1   :  { %874 = vrot.lane.b32.xlu1 %v5210_v60, %s5871_s3 }
 0xa69   :  { %v788_v39 = vpop.xlane.xlu1 %787 }
 0xa6a   :  { %v789_v40 = vsub.f32 %v785_v36, %v788_v39 }
 0xa6c   :  { %v790_v41 = vmul.f32 1.442695, %v789_v40 }
 0xa6d   :  { %v877_v47 = vpop.permute.xlu1 %876 }
 0xa6e   :  { %4818 = vpow2.f32 %v790_v41 }
 0xa71   :  { %v875_v49 = vpop.permute.xlu1 %874 }
 0xa78   :  { %v4819_v42 = vpop.eup %4818 }
 0xa79   :  { %v792_v43 = vsel %vm450_vm8, %v4819_v42, 0.0 }
 0xa7a   :  { %793 = vadd.xlane.f32.xlu0 %v792_v43 }
 0xa90   :  { %797 = vrot.lane.b32.xlu0 %v5210_v60, %s5867_s26 }
 0xb07   :  { %v794_v44 = vpop.xlane.xlu0 %793 }
 0xb08   :  { %4820 = vrcp.f32 %v794_v44 }
 0xb0b   :  { %v798_v45 = vpop.permute.xlu0 %797 }
 0xb0c   :  { %4360 = vmatpush3.msk.msra.mxu1 %vm184_vm2, %v798_v45 }
 0xb0d   :  { %4364 = vmatprep.subr.mxu1 %v4931_v55 }
 0xb12   :  { %v4821_v46 = vpop.eup %4820 }
 0xb13   :  { %v796_v48 = vmul.f32 %v4821_v46, %v4819_v42 }
 0xb15   :  { %4362 = vmatmul.mubr.msk.f32.vlgmr.msra.gmra.mrb[12].mxu1 %vm464_vm9, %v796_v48 }
 0xb16   :  { %4365 = vmatpush3.xpose.msk.msra.mxu1 %vm374_vm7, %v877_v47  ;;  %4366 = vmatprep.mubr.msk.f32.mxu1 %vm4932_vm6, %v4931_v55 }
 0xb17   :  { %4369 = vmatprep.subr.mxu1 %v4931_v55 }
 0xb19   :  { %4367 = vmatmul.mubr.msk.f32.vlgmr.msra.gmra.mrb[14].mxu1 %vm374_vm7, %v875_v49 }
 0xb1a   :  { %4371 = vmatprep.mubr.msk.f32.mxu1 %vm4932_vm6, %v4931_v55 }
 0xbe8   :  { %v5278_v50 = vpop.f32.mrb[12].mxu1 }
 0xbe9   :  { %v4363_v51 = vpop.f32.mrb[13].mxu1 }
 0xbec   :  { %v948_v52 = vpop.f32.mrb[14].mxu1 }
 0xbed   :  { %v952_v53 = vmul.f32 0.35355338, %v948_v52  ;;  %v4368_v54 = vpop.f32.mrb[15].mxu1 }
 0xbef   :  { %v953_v56 = vsel %vm450_vm8, %v952_v53, -inf }
 0xbf0   :  { %954 = vmax.xlane.f32.xlu0 %v953_v56 }
 0xc06   :  { %964 = vrot.lane.b32.xlu0 %v5210_v60, %s5869_s28 }
 0xc7d   :  { %v955_v57 = vpop.xlane.xlu0 %954 }
 0xc7e   :  { %v956_v59 = vsub.f32 %v952_v53, %v955_v57 }
 0xc80   :  { %v957_v61 = vmul.f32 1.442695, %v956_v59 }
 0xc81   :  { %v965_v62 = vpop.permute.xlu0 %964 }
 0xc82   :  { %4822 = vpow2.f32 %v957_v61  ;;  %4370 = vmatpush3.msk.msra.mxu1 %vm184_vm2, %v965_v62 }
 0xc83   :  { %4374 = vmatprep.subr.mxu1 %v4931_v55 }
 0xc8c   :  { %v4823_v63 = vpop.eup %4822 }
 0xc8d   :  { %v959_v0 = vsel %vm450_vm8, %v4823_v63, 0.0 }
 0xc8e   :  { %960 = vadd.xlane.f32.xlu1 %v959_v0 }
 0xc9f   :  { %1063 = vrot.lane.b32.xlu1 %v5289_v4, %s4933_s5 }
 0xca3   :  { %1230 = vrot.lane.b32.xlu1 %v5289_v4, %s4934_s22 }
 0xca7   :  { %1397 = vrot.lane.b32.xlu1 %v5289_v4, %s4939_s25 }
 0xd1b   :  { %v961_v5 = vpop.xlane.xlu1 %960 }
 0xd1c   :  { %4824 = vrcp.f32 %v961_v5 }
 0xd1f   :  { %v1064_v6 = vpop.permute.xlu1 %1063 }
 0xd23   :  { %v1231_v7 = vpop.permute.xlu1 %1230 }
 0xd26   :  { %v4825_v58 = vpop.eup %4824 }
 0xd27   :  { %v963_v8 = vmul.f32 %v4825_v58, %v4823_v63  ;;  %v1398_v60 = vpop.permute.xlu1 %1397 }
 0xd28   :  { %4395 = vmatpush3.xpose.msk.msra.mxu0 %vm374_vm7, %v1398_v60 }
 0xd29   :  { %4372 = vmatmul.mubr.msk.f32.vlgmr.msra.gmra.mrb[16].mxu1 %vm464_vm9, %v963_v8  ;;  %4404 = vmatprep.subr.mxu0 %v4931_v55 }
 0xd2a   :  { %4375 = vmatpush3.xpose.msk.msra.mxu1 %vm374_vm7, %v1064_v6  ;;  %4376 = vmatprep.mubr.msk.f32.mxu1 %vm4932_vm6, %v4931_v55 }
 0xd2b   :  { %4379 = vmatprep.subr.mxu1 %v4931_v55 }
 0xd2d   :  { %4377 = vmatmul.mubr.msk.f32.vlgmr.msra.gmra.mrb[18].mxu1 %vm374_vm7, %v5289_v4 }
 0xd2e   :  { %4381 = vmatprep.mubr.msk.f32.mxu1 %vm4932_vm6, %v4931_v55 }
 0xdfc   :  { %v5308_v9 = vpop.f32.mrb[16].mxu1 }
 0xdfd   :  { %v4373_v10 = vpop.f32.mrb[17].mxu1 }
 0xe00   :  { %v1135_v11 = vpop.f32.mrb[18].mxu1 }
 0xe01   :  { %v1139_v12 = vmul.f32 0.35355338, %v1135_v11  ;;  %v4378_v13 = vpop.f32.mrb[19].mxu1  ;;  %v1748_v11 = vld [vmem:[%s5853_s10] sm:$0xff] }
 0xe03   :  { %v1140_v15 = vsel %vm450_vm8, %v1139_v12, -inf }
 0xe04   :  { %1141 = vmax.xlane.f32.xlu0 %v1140_v15  ;;  %v1750_v15 = vld [vmem:[%s5853_s10 + $0x10] sm:$0xff] }
 0xe1a   :  { %1151 = vrot.lane.b32.xlu0 %v5289_v4, %s4935_s23 }
 0xe1e   :  { %1228 = vrot.lane.b32.xlu0 %v5289_v4, %s4936_s1 }
 0xe22   :  { %1395 = vrot.lane.b32.xlu0 %v5289_v4, %s5873_s2 }
 0xe26   :  { %1562 = vrot.lane.b32.xlu0 %v5289_v4, %s5871_s3 }
 0xe91   :  { %v1142_v16 = vpop.xlane.xlu0 %1141 }
 0xe92   :  { %v1143_v18 = vsub.f32 %v1139_v12, %v1142_v16  ;;  %v1749_v12 = vld [vmem:[%s5853_s10 + $0x8] sm:$0xff]  ;;  %v1751_v16 = vld [vmem:[%s5853_s10 + $0x18] sm:$0xff] }
 0xe93   :  { %v4674_v13 = vpack.c.bf16 %v1749_v12, %v1748_v11 }
 0xe94   :  { %v1144_v19 = vmul.f32 1.442695, %v1143_v18  ;;  %v4678_v18 = vpack.c.bf16 %v1751_v16, %v1750_v15 }
 0xe95   :  { %v1152_v20 = vpop.permute.xlu0 %1151 }
 0xe96   :  { %4826 = vpow2.f32 %v1144_v19  ;;  %4380 = vmatpush3.msk.msra.mxu1 %vm184_vm2, %v1152_v20 }
 0xe97   :  { %4384 = vmatprep.subr.mxu1 %v4931_v55 }
 0xe99   :  { %v1229_v22 = vpop.permute.xlu0 %1228 }
 0xe9d   :  { %v1396_v23 = vpop.permute.xlu0 %1395 }
 0xe9e   :  { %4397 = vmatmul.mubr.msk.f32.vlgmr.msra.gmra.mrb[2].mxu0 %vm374_vm7, %v1396_v23 }
 0xe9f   :  { %4406 = vmatprep.mubr.msk.f32.mxu0 %vm4932_vm6, %v4931_v55 }
 0xea0   :  { %v4827_v24 = vpop.eup %4826 }
 0xea1   :  { %v1146_v25 = vsel %vm450_vm8, %v4827_v24, 0.0  ;;  %v1563_v28 = vpop.permute.xlu0 %1562 }
 0xea2   :  { %1147 = vadd.xlane.f32.xlu1 %v1146_v25 }
 0xeb3   :  { %1564 = vrot.lane.b32.xlu1 %v5289_v4, %s5877_s27 }
 0xf2f   :  { %v1148_v26 = vpop.xlane.xlu1 %1147 }
 0xf30   :  { %4828 = vrcp.f32 %v1148_v26 }
 0xf33   :  { %v1565_v27 = vpop.permute.xlu1 %1564 }
 0xf34   :  { %4405 = vmatpush3.xpose.msk.msra.mxu0 %vm374_vm7, %v1565_v27 }
 0xf37   :  { %4407 = vmatmul.mubr.msk.f32.vlgmr.msra.gmra.mrb[4].mxu0 %vm374_vm7, %v1563_v28 }
 0xf3a   :  { %v4829_v29 = vpop.eup %4828 }
 0xf3b   :  { %v1150_v30 = vmul.f32 %v4829_v29, %v4827_v24 }
 0xf3d   :  { %4382 = vmatmul.mubr.msk.f32.vlgmr.msra.gmra.mrb[20].mxu1 %vm464_vm9, %v1150_v30 }
 0xf3e   :  { %4385 = vmatpush3.xpose.msk.msra.mxu1 %vm374_vm7, %v1231_v7  ;;  %4386 = vmatprep.mubr.msk.f32.mxu1 %vm4932_vm6, %v4931_v55 }
 0xf3f   :  { %4389 = vmatprep.subr.mxu1 %v4931_v55 }
 0xf41   :  { %4387 = vmatmul.mubr.msk.f32.vlgmr.msra.gmra.mrb[22].mxu1 %vm374_vm7, %v1229_v22 }
 0xf42   :  { %4391 = vmatprep.mubr.msk.f32.mxu1 %vm4932_vm6, %v4931_v55 }
 0xf71   :  { %v1469_v31 = vpop.f32.mrb[2].mxu0 }
 0xf72   :  { %v1473_v32 = vmul.f32 0.35355338, %v1469_v31  ;;  %v4398_v34 = vpop.f32.mrb[3].mxu0 }
 0xf74   :  { %v1474_v35 = vsel %vm450_vm8, %v1473_v32, -inf }
 0xf75   :  { %1475 = vmax.xlane.f32.xlu0 %v1474_v35 }
0x1002   :  { %v1476_v36 = vpop.xlane.xlu0 %1475 }
0x1003   :  { %v1477_v37 = vsub.f32 %v1473_v32, %v1476_v36 }
0x1005   :  { %v1478_v38 = vmul.f32 1.442695, %v1477_v37 }
0x1007   :  { %4830 = vpow2.f32 %v1478_v38 }
0x100a   :  { %v1636_v39 = vpop.f32.mrb[4].mxu0 }
0x100b   :  { %v1640_v40 = vmul.f32 0.35355338, %v1636_v39  ;;  %v4408_v41 = vpop.f32.mrb[5].mxu0 }
0x100d   :  { %v1641_v42 = vsel %vm450_vm8, %v1640_v40, -inf }
0x100e   :  { %1642 = vmax.xlane.f32.xlu0 %v1641_v42 }
0x1010   :  { %v5339_v43 = vpop.f32.mrb[20].mxu1 }
0x1011   :  { %v4383_v44 = vpop.f32.mrb[21].mxu1  ;;  %v4831_v49 = vpop.eup %4830 }
0x1012   :  { %v1480_v51 = vsel %vm450_vm8, %v4831_v49, 0.0 }
0x1014   :  { %v1302_v45 = vpop.f32.mrb[22].mxu1 }
0x1015   :  { %v1306_v46 = vmul.f32 0.35355338, %v1302_v45  ;;  %v4388_v47 = vpop.f32.mrb[23].mxu1 }
0x1017   :  { %v1307_v48 = vsel %vm450_vm8, %v1306_v46, -inf }
0x1018   :  { %1308 = vmax.xlane.f32.xlu1 %v1307_v48 }
0x101c   :  { %1481 = vadd.xlane.f32.xlu1 %v1480_v51 }
0x102d   :  { %1318 = vrot.lane.b32.xlu1 %v5289_v4, %s5875_s24 }
0x1031   :  { %1652 = vrot.lane.b32.xlu1 %v5289_v4, %s5869_s28  ;;  %s5899_s28 = smov 24  }
0x109b   :  { %v1643_v52 = vpop.xlane.xlu0 %1642 }
0x109c   :  { %v1644_v53 = vsub.f32 %v1640_v40, %v1643_v52  ;;  %v4092_v40 = vld [vmem:[%s5854_s11] ss:$0 sm:$0xff] }
0x109e   :  { %v1645_v54 = vmul.f32 1.442695, %v1644_v53 }
0x10a0   :  { %4832 = vpow2.f32 %v1645_v54 }
0x10a5   :  { %v1309_v56 = vpop.xlane.xlu1 %1308 }
0x10a6   :  { %v1310_v57 = vsub.f32 %v1306_v46, %v1309_v56 }
0x10a8   :  { %v1311_v59 = vmul.f32 1.442695, %v1310_v57 }
0x10a9   :  { %v1482_v61 = vpop.xlane.xlu1 %1481 }
0x10aa   :  { %v4833_v62 = vpop.eup %4832  ;;  %4834 = vpow2.f32 %v1311_v59  ;;  %v1879_v59 = vld [vmem:[%s5857_s14] sm:$0xff] }
0x10ab   :  { %v1647_v63 = vsel %vm450_vm8, %v4833_v62, 0.0 }
0x10ac   :  { %1648 = vadd.xlane.f32.xlu0 %v1647_v63  ;;  %v1881_v63 = vld [vmem:[%s5857_s14 + $0x10] sm:$0xff] }
0x10ad   :  { %v1319_v0 = vpop.permute.xlu1 %1318 }
0x10ae   :  { %4390 = vmatpush3.msk.msra.mxu1 %vm184_vm2, %v1319_v0  ;;  %v1882_v0 = vld [vmem:[%s5857_s14 + $0x18] sm:$0xff] }
0x10af   :  { %4399 = vmatprep.subr.mxu1 %v4931_v55 }
0x10b4   :  { %v4835_v1 = vpop.eup %4834 }
0x10b5   :  { %v1313_v2 = vsel %vm450_vm8, %v4835_v1, 0.0 }
0x10b6   :  { %1314 = vadd.xlane.f32.xlu0 %v1313_v2 }
0x10cc   :  { %1485 = vrot.lane.b32.xlu0 %v5289_v4, %s5867_s26  ;;  %v1653_v4 = vpop.permute.xlu1 %1652  ;;  %s5879_s26 = smov 24  }
0x10d0   :  { %1042 = vrot.lane.b32.xlu0 %v5258_v33, %s4944_s29 }
0x10d4   :  { %1046 = vrot.lane.b32.xlu0 %v5278_v50, %s4945_s0 }
0x1139   :  { %v1649_v5 = vpop.xlane.xlu0 %1648 }
0x1143   :  { %v1315_v6 = vpop.xlane.xlu0 %1314 }
0x1144   :  { %4836 = vrcp.f32 %v1315_v6 }
0x1145   :  { %4838 = vrcp.f32 %v1482_v61  ;;  %v1880_v61 = vld [vmem:[%s5857_s14 + $0x8] sm:$0xff] }
0x1146   :  { %4840 = vrcp.f32 %v1649_v5 }
0x1147   :  { %v1486_v60 = vpop.permute.xlu0 %1485 }
0x114b   :  { %v1043_v27 = vpop.permute.xlu0 %1042 }
0x114c   :  { %v1053_v35 = vsel %vm374_vm7, %v5238_v14, %v1043_v27 }
0x114e   :  { %v4837_v7 = vpop.eup %4836 }
0x114f   :  { %v1317_v58 = vmul.f32 %v4837_v7, %v4835_v1  ;;  %v4839_v8 = vpop.eup %4838  ;;  %v1047_v32 = vpop.permute.xlu0 %1046  ;;  %v4686_v1 = vpack.c.bf16 %v1882_v0, %v1881_v63  ;;  %v4102_v63 = vld [vmem:[%s5860_s17] ss:$0 sm:$0xff] }
0x1150   :  { %v1484_v33 = vmul.f32 %v4839_v8, %v4831_v49  ;;  %v4841_v50 = vpop.eup %4840  ;;  %v1055_v36 = vsel %vm1054_vm12, %v1053_v35, %v1047_v32  ;;  %v1994_v32 = vld [vmem:[%s5859_s16 + $0x48] sm:$0xff]  ;;  %v1995_v35 = vld [vmem:[%s5859_s16 + $0x50] sm:$0xff] }
0x1151   :  { %4392 = vmatmul.mubr.msk.f32.vlgmr.msra.gmra.mrb[24].mxu1 %vm464_vm9, %v1317_v58  ;;  %v1651_v10 = vmul.f32 %v4841_v50, %v4833_v62  ;;  %v4682_v62 = vpack.c.bf16 %v1880_v61, %v1879_v59 }
0x1152   :  { %4400 = vmatpush3.msk.msra.mxu1 %vm184_vm2, %v1486_v60  ;;  %4401 = vmatprep.mubr.msk.f32.mxu1 %vm4932_vm6, %v4931_v55 }
0x1153   :  { %4409 = vmatprep.subr.mxu1 %v4931_v55 }
0x1155   :  { %4402 = vmatmul.mubr.msk.f32.vlgmr.msra.gmra.mrb[26].mxu1 %vm464_vm9, %v1484_v33  ;;  %v4095_v33 = vld [vmem:[%s5855_s12] ss:$0 sm:$0xff] }
0x1156   :  { %4410 = vmatpush3.msk.msra.mxu1 %vm184_vm2, %v1653_v4  ;;  %4411 = vmatprep.mubr.msk.f32.mxu1 %vm4932_vm6, %v4931_v55  ;;  %v4096_v4 = vld [vmem:[%s5856_s13] ss:$0 sm:$0xff] }
0x1157   :  { %4675 = vmatprep.subr.bf16.mxu1 %v4674_v13 }
0x1159   :  { %4412 = vmatmul.mubr.msk.f32.vlgmr.msra.gmra.mrb[28].mxu1 %vm464_vm9, %v1651_v10 }
0x115a   :  { %4677 = vmatpush3.bf16.msra.mxu1 %v4674_v13 }
0x115b   :  { %4679 = vmatprep.subr.bf16.mxu1 %v4678_v18 }
0x115e   :  { %4681 = vmatpush3.bf16.msra.mxu1 %v4678_v18  ;;  %v1985_v18 = vld [vmem:[%s5859_s16] sm:$0xff] }
0x115f   :  { %4683 = vmatprep.subr.bf16.mxu1 %v4682_v62 }
0x1224   :  { %v1391_v19 = vpop.f32.mrb[24].mxu1 }
0x1225   :  { %1730 = vrot.lane.b32.xlu1 %v1391_v19, %s4944_s29  ;;  %v4393_v20 = vpop.f32.mrb[25].mxu1  ;;  %v1986_v19 = vld [vmem:[%s5859_s16 + $0x8] sm:$0xff] }
0x1226   :  { %v4690_v20 = vpack.c.bf16 %v1986_v19, %v1985_v18  ;;  %v4107_v19 = vld [vmem:[%s5851_s8 + $0x30] sm:$0xff] }
0x1228   :  { %v1558_v22 = vpop.f32.mrb[26].mxu1  ;;  %4691 = vmatprep.subr.bf16.mxu0 %v4690_v20 }
0x1229   :  { %1734 = vrot.lane.b32.xlu1 %v1558_v22, %s4945_s0  ;;  %v4403_v23 = vpop.f32.mrb[27].mxu1  ;;  %4693 = vmatpush3.bf16.msra.mxu0 %v4690_v20  ;;  %v1987_v22 = vld [vmem:[%s5859_s16 + $0x10] sm:$0xff]  ;;  %v4108_v20 = vld [vmem:[%s5851_s8 + $0x38] sm:$0xff] }
0x122a   :  { %v1988_v23 = vld [vmem:[%s5859_s16 + $0x18] sm:$0xff] }
0x122c   :  { %v1725_v24 = vpop.f32.mrb[28].mxu1 }
0x122d   :  { %1738 = vrot.lane.b32.xlu1 %v1725_v24, %s5879_s26  ;;  %v4413_v25 = vpop.f32.mrb[29].mxu1  ;;  %v4694_v24 = vpack.c.bf16 %v1988_v23, %v1987_v22  ;;  %v4726_v22 = vpack.c.bf16 %v4108_v20, %v4107_v19 }
0x122e   :  { %v1989_v25 = vld [vmem:[%s5859_s16 + $0x20] sm:$0xff] }
0x122f   :  { %4695 = vmatprep.subr.bf16.mxu0 %v4694_v24 }
0x1230   :  { %4697 = vmatpush3.bf16.msra.mxu0 %v4694_v24 }
0x1231   :  { %1050 = vrot.lane.b32.xlu1 %v5308_v9, %s5879_s26 }
0x1297   :  { %v1731_v26 = vpop.permute.xlu1 %1730 }
0x1298   :  { %v1741_v29 = vsel %vm374_vm7, %v5339_v43, %v1731_v26  ;;  %v1990_v26 = vld [vmem:[%s5859_s16 + $0x28] sm:$0xff] }
0x1299   :  { %v4698_v27 = vpack.c.bf16 %v1990_v26, %v1989_v25 }
0x129b   :  { %v1735_v28 = vpop.permute.xlu1 %1734  ;;  %4699 = vmatprep.subr.bf16.mxu0 %v4698_v27 }
0x129c   :  { %v1742_v30 = vsel %vm1054_vm12, %v1741_v29, %v1735_v28  ;;  %4701 = vmatpush3.bf16.msra.mxu0 %v4698_v27  ;;  %v1991_v28 = vld [vmem:[%s5859_s16 + $0x30] sm:$0xff]  ;;  %v1992_v29 = vld [vmem:[%s5859_s16 + $0x38] sm:$0xff] }
0x129f   :  { %v1739_v31 = vpop.permute.xlu1 %1738 }
0x12a0   :  { %v1743_v34 = vsel %vm1056_vm11, %v1742_v30, %v1739_v31  ;;  %v4702_v30 = vpack.c.bf16 %v1992_v29, %v1991_v28  ;;  %v1993_v31 = vld [vmem:[%s5859_s16 + $0x40] sm:$0xff] }
0x12a1   :  { %v1745_v9 = vrot.slane %v1743_v34, 3  ;;  %v4706_v34 = vpack.c.bf16 %v1994_v32, %v1993_v31 }
0x12a2   :  { %4703 = vmatprep.subr.bf16.mxu0 %v4702_v30 }
0x12a3   :  { %v1051_v37 = vpop.permute.xlu1 %1050  ;;  %4705 = vmatpush3.bf16.msra.mxu0 %v4702_v30  ;;  %v4103_v30 = vld [vmem:[%s5849_s6 + $0x1] ss:$0 sm:$0xff] }
0x12a4   :  { %v1057_v38 = vsel %vm1056_vm11, %v1055_v36, %v1051_v37  ;;  %4707 = vmatprep.subr.bf16.mxu0 %v4706_v34  ;;  %v1996_v36 = vld [vmem:[%s5859_s16 + $0x58] sm:$0xff]  ;;  %v1997_v37 = vld [vmem:[%s5859_s16 + $0x60] sm:$0xff] }
0x12a5   :  { %v1747_v39 = vsel %vm184_vm2, %v1057_v38, %v1745_v9  ;;  %v1998_v38 = vld [vmem:[%s5859_s16 + $0x68] sm:$0xff] }
0x12a6   :  { %4422 = vmatprep.mubr.msk.f32.mxu1 %vm196_vm4, %v1747_v39  ;;  %v4714_v39 = vpack.c.bf16 %v1998_v38, %v1997_v37 }
0x12a7   :  { %4423 = vmatmul.mubr.msk.f32.vlgmr.msra.gmra.mrb[30].mxu1 %vm196_vm4, %v1745_v9  ;;  %4709 = vmatpush3.bf16.msra.mxu0 %v4706_v34  ;;  %v4710_v9 = vpack.c.bf16 %v1996_v36, %v1995_v35  ;;  %v4104_v35 = vld [vmem:[%s5850_s7 + $0x1] ss:$0 sm:$0xff]  ;;  %s5893_s7 = smov 72  }
0x12a8   :  { %4685 = vmatpush3.bf16.msra.mxu1 %v4682_v62 }
0x12a9   :  { %4687 = vmatprep.subr.bf16.mxu1 %v4686_v1  ;;  %4711 = vmatprep.subr.bf16.mxu0 %v4710_v9 }
0x12ab   :  { %4713 = vmatpush3.bf16.msra.mxu0 %v4710_v9 }
0x12ac   :  { %4689 = vmatpush3.bf16.msra.mxu1 %v4686_v1  ;;  %4715 = vmatprep.subr.bf16.mxu0 %v4714_v39 }
0x12af   :  { %4717 = vmatpush3.bf16.msra.mxu0 %v4714_v39  ;;  %v4109_v39 = vld [vmem:[%s5852_s9 + $0x1] ss:$0 sm:$0xff]  ;;  %s5894_s9 = smov 56  }
0x137a   :  { %v4424_v41 = vpop.f32.mrb[30].mxu1 }
0x137b   :  { %v1834_v42 = vadd.f32 %v4424_v41, %v4092_v40  ;;  %v1828_v43 = vpop.f32.mrb[31].mxu1  ;;  %v2000_v41 = vld [vmem:[%s5859_s16 + $0x78] sm:$0xff] }
0x137c   :  { %v1829_v14 = vadd.f32 %v4092_v40, %v1828_v43  ;;  %v1999_v40 = vld [vmem:[%s5859_s16 + $0x70] sm:$0xff]  ;;  %v4097_v43 = vld [vmem:[%s5858_s15] ss:$0 sm:$0xff] }
0x137d   :  { %v5399_v44 = vadd.f32 %v1834_v42, %v5171_v21  ;;  %v4718_v42 = vpack.c.bf16 %v2000_v41, %v1999_v40 }
0x137e   :  { %v5402_v45 = vadd.f32 %v1829_v14, %v5167_v17 }
0x137f   :  { %v1844_v46 = vsel %vm200_vm5, %v5399_v44, 0.0  ;;  %4719 = vmatprep.subr.bf16.mxu0 %v4718_v42 }
0x1380   :  { %1845 = vadd.xlane.f32.xlu1 %v1844_v46  ;;  %v1841_v47 = vsel %vm196_vm4, %v5402_v45, 0.0  ;;  %4721 = vmatpush3.bf16.msra.mxu0 %v4718_v42 }
0x1381   :  { %1842 = vadd.xlane.f32.xlu0 %v1841_v47  ;;  %4512 = vmatprep.subr.mxu0 %v4931_v55 }
0x140d   :  { %v1846_v48 = vpop.xlane.xlu1 %1845 }
0x140e   :  { %v1848_v49 = vmul.f32 0.03125, %v1846_v48  ;;  %v1843_v51 = vpop.xlane.xlu0 %1842 }
0x140f   :  { %v1847_v52 = vmul.f32 0.03125, %v1843_v51 }
0x1410   :  { %v1850_v53 = vsub.f32 %v5399_v44, %v1848_v49 }
0x1411   :  { %v1849_v21 = vsub.f32 %v5402_v45, %v1847_v52 }
0x1412   :  { %v1852_v56 = vmul.f32 %v1850_v53, %v1850_v53 }
0x1413   :  { %v1851_v54 = vmul.f32 %v1849_v21, %v1849_v21 }
0x1414   :  { %v1856_v57 = vsel %vm200_vm5, %v1852_v56, 0.0 }
0x1415   :  { %v1853_v17 = vsel %vm196_vm4, %v1851_v54, 0.0 }
0x1416   :  { %1854 = vadd.xlane.f32.xlu0 %v1853_v17 }
0x141a   :  { %1857 = vadd.xlane.f32.xlu0 %v1856_v57 }
0x14a3   :  { %v1855_v2 = vpop.xlane.xlu0 %1854 }
0x14a4   :  { %v1859_v5 = vmul.f32 0.03125, %v1855_v2 }
0x14a6   :  { %v1861_v6 = vadd.f32 1e-05, %v1859_v5 }
0x14a7   :  { %v1858_v7 = vpop.xlane.xlu0 %1857 }
0x14a8   :  { %4842 = vrsqrt.f32 %v1861_v6  ;;  %v1860_v58 = vmul.f32 0.03125, %v1858_v7 }
0x14aa   :  { %v1862_v8 = vadd.f32 1e-05, %v1860_v58 }
0x14ac   :  { %4844 = vrsqrt.f32 %v1862_v8 }
0x14b2   :  { %v4843_v60 = vpop.eup %4842 }
0x14b3   :  { %v1865_v50 = vmul.f32 %v4843_v60, %v1849_v21 }
0x14b5   :  { %v1871_v10 = vmul.f32 %v4095_v33, %v1865_v50 }
0x14b6   :  { %v4845_v11 = vpop.eup %4844 }
0x14b7   :  { %v1866_v12 = vmul.f32 %v4845_v11, %v1850_v53  ;;  %v1877_v13 = vadd.f32 %v4096_v4, %v1871_v10 }
0x14b9   :  { %v1872_v15 = vmul.f32 %v4095_v33, %v1866_v12  ;;  %4433 = vmatprep.mubr.msk.f32.mxu1 %vm196_vm4, %v1877_v13 }
0x14bb   :  { %v1878_v16 = vadd.f32 %v4096_v4, %v1872_v15  ;;  %v4105_v15 = vld [vmem:[%s5851_s8 + $0x20] sm:$0xff] }
0x14bd   :  { %4434 = vmatmul.mubr.msk.f32.vlgmr.msra.gmra.mrb[32].mxu1 %vm196_vm4, %v1878_v16  ;;  %v4106_v16 = vld [vmem:[%s5851_s8 + $0x28] sm:$0xff] }
0x14be   :  { %v4722_v18 = vpack.c.bf16 %v4106_v16, %v4105_v15 }
0x14c0   :  { %4723 = vmatprep.subr.bf16.mxu1 %v4722_v18 }
0x14c1   :  { %4725 = vmatpush3.bf16.msra.mxu1 %v4722_v18 }
0x14c2   :  { %4727 = vmatprep.subr.bf16.mxu1 %v4726_v22 }
0x14c5   :  { %4729 = vmatpush3.bf16.msra.mxu1 %v4726_v22 }
0x14c6   :  { %4482 = vmatprep.subr.mxu1 %v4931_v55 }
0x1590   :  { %v4435_v14 = vpop.f32.mrb[32].mxu1 }
0x1591   :  { %v1966_v46 = vadd.f32 %v4435_v14, %v4097_v43  ;;  %v1960_v47 = vpop.f32.mrb[33].mxu1 }
0x1592   :  { %v1961_v48 = vadd.f32 %v4097_v43, %v1960_v47 }
0x1593   :  { %v4101_v49 = vmul.f32 -1.702, %v1966_v46 }
0x1594   :  { %v4100_v51 = vmul.f32 -1.702, %v1961_v48 }
0x1595   :  { %v1975_v52 = vmul.f32 1.442695, %v4101_v49 }
0x1596   :  { %v1973_v53 = vmul.f32 1.442695, %v4100_v51 }
0x1597   :  { %4846 = vpow2.f32 %v1975_v52 }
0x1598   :  { %4848 = vpow2.f32 %v1973_v53 }
0x15a1   :  { %v4847_v21 = vpop.eup %4846 }
0x15a2   :  { %v4849_v54 = vpop.eup %4848  ;;  %v1978_v17 = vadd.f32 1.0, %v4847_v21 }
0x15a3   :  { %v1977_v56 = vadd.f32 1.0, %v4849_v54 }
0x15a4   :  { %4850 = vrcp.f32 %v1978_v17 }
0x15a5   :  { %4852 = vrcp.f32 %v1977_v56 }
0x15ae   :  { %v4851_v57 = vpop.eup %4850 }
0x15af   :  { %v4853_v59 = vpop.eup %4852  ;;  %v1984_v62 = vmul.f32 %v4851_v57, %v1966_v46 }
0x15b0   :  { %v1983_v61 = vmul.f32 %v4853_v59, %v1961_v48 }
0x15b2   :  { %4468 = vmatprep.mubr.f32.mxu0 %v1983_v61 }
0x15b3   :  { %4469 = vmatmul.mubr.f32.vlgmr.msra.gmra.mrb[6].mxu0 %v1984_v62 }
0x15b4   :  { %4514 = vmatprep.mubr.msk.f32.mxu0 %vm4932_vm6, %v4931_v55 }
0x1686   :  { %v4470_v0 = vpop.f32.mrb[6].mxu0 }
0x1687   :  { %v2078_v1 = vadd.f32 %v4470_v0, %v4102_v63  ;;  %v2072_v2 = vpop.f32.mrb[7].mxu0 }
0x1688   :  { %v2073_v5 = vadd.f32 %v4102_v63, %v2072_v2 }
0x1689   :  { %v5490_v6 = vadd.f32 %v2078_v1, %v5399_v44 }
0x168a   :  { %v5493_v7 = vadd.f32 %v2073_v5, %v5402_v45 }
0x168b   :  { %v2088_v58 = vsel %vm200_vm5, %v5490_v6, 0.0 }
0x168c   :  { %2089 = vadd.xlane.f32.xlu1 %v2088_v58  ;;  %v2085_v8 = vsel %vm196_vm4, %v5493_v7, 0.0 }
0x168d   :  { %2086 = vadd.xlane.f32.xlu0 %v2085_v8 }
0x1719   :  { %v2090_v60 = vpop.xlane.xlu1 %2089 }
0x171a   :  { %v2092_v33 = vmul.f32 0.03125, %v2090_v60  ;;  %v2087_v50 = vpop.xlane.xlu0 %2086 }
0x171b   :  { %v2091_v4 = vmul.f32 0.03125, %v2087_v50 }
0x171c   :  { %v2094_v10 = vsub.f32 %v5490_v6, %v2092_v33 }
0x171d   :  { %v2093_v44 = vsub.f32 %v5493_v7, %v2091_v4 }
0x171e   :  { %v2096_v11 = vmul.f32 %v2094_v10, %v2094_v10 }
0x171f   :  { %v2095_v12 = vmul.f32 %v2093_v44, %v2093_v44 }
0x1720   :  { %v2100_v45 = vsel %vm200_vm5, %v2096_v11, 0.0 }
0x1721   :  { %2101 = vadd.xlane.f32.xlu1 %v2100_v45  ;;  %v2097_v13 = vsel %vm196_vm4, %v2095_v12, 0.0 }
0x1722   :  { %2098 = vadd.xlane.f32.xlu0 %v2097_v13 }
0x17ae   :  { %v2102_v23 = vpop.xlane.xlu1 %2101 }
0x17af   :  { %v2104_v24 = vmul.f32 0.03125, %v2102_v23  ;;  %v2099_v25 = vpop.xlane.xlu0 %2098 }
0x17b0   :  { %v2103_v26 = vmul.f32 0.03125, %v2099_v25 }
0x17b1   :  { %v2106_v27 = vadd.f32 1e-05, %v2104_v24 }
0x17b2   :  { %v2105_v28 = vadd.f32 1e-05, %v2103_v26 }
0x17b3   :  { %4854 = vrsqrt.f32 %v2106_v27 }
0x17b4   :  { %4856 = vrsqrt.f32 %v2105_v28 }
0x17bd   :  { %v4855_v29 = vpop.eup %4854 }
0x17be   :  { %v4857_v31 = vpop.eup %4856  ;;  %v2110_v32 = vmul.f32 %v4855_v29, %v2094_v10 }
0x17bf   :  { %v2109_v34 = vmul.f32 %v4857_v31, %v2093_v44 }
0x17c0   :  { %v2116_v36 = vmul.f32 %v4103_v30, %v2110_v32 }
0x17c1   :  { %v2115_v9 = vmul.f32 %v4103_v30, %v2109_v34 }
0x17c2   :  { %v2122_v38 = vadd.f32 %v4104_v35, %v2116_v36 }
0x17c3   :  { %v2121_v37 = vadd.f32 %v4104_v35, %v2115_v9 }
0x17c5   :  { %4479 = vmatprep.mubr.msk.f32.mxu1 %vm196_vm4, %v2121_v37 }
0x17c6   :  { %4480 = vmatmul.mubr.msk.f32.vlgmr.msra.gmra.mrb[34].mxu1 %vm196_vm4, %v2122_v38 }
0x17c7   :  { %4484 = vmatprep.mubr.msk.f32.mxu1 %vm4932_vm6, %v4931_v55 }
0x1899   :  { %v4481_v40 = vpop.f32.mrb[34].mxu1 }
0x189a   :  { %v2211_v41 = vadd.f32 %v4481_v40, %v4109_v39  ;;  %v2205_v42 = vpop.f32.mrb[35].mxu1 }
0x189b   :  { %v5529_v43 = vadd.f32 %v4109_v39, %v2205_v42 }
0x189c   :  { %v2898_v33 = vrot.slane %v2211_v41, 5 }
0x189d   :  { %2215 = vrot.lane.b32.xlu0 %v5529_v43, %s4933_s5  ;;  %v2897_v50 = vrot.slane %v5529_v43, 5 }
0x189f   :  { %v5576_v4 = vsel %vm1059_vm10, %v2897_v50, %v2898_v33 }
0x18a1   :  { %2382 = vrot.lane.b32.xlu0 %v5529_v43, %s4934_s22 }
0x190f   :  { %v2216_v14 = vpop.permute.xlu0 %2215 }
0x1910   :  { %4483 = vmatpush3.xpose.msk.msra.mxu1 %vm374_vm7, %v2216_v14 }
0x1911   :  { %4487 = vmatprep.subr.mxu1 %v4931_v55 }
0x1913   :  { %4485 = vmatmul.mubr.msk.f32.vlgmr.msra.gmra.mrb[36].mxu1 %vm374_vm7, %v5529_v43  ;;  %v2383_v0 = vpop.permute.xlu0 %2382 }
0x1914   :  { %4489 = vmatprep.mubr.msk.f32.mxu1 %vm4932_vm6, %v4931_v55 }
0x19e6   :  { %v2287_v46 = vpop.f32.mrb[36].mxu1 }
0x19e7   :  { %v2291_v47 = vmul.f32 0.35355338, %v2287_v46  ;;  %v4486_v48 = vpop.f32.mrb[37].mxu1 }
0x19e9   :  { %v2292_v49 = vsel %vm450_vm8, %v2291_v47, -inf }
0x19ea   :  { %2293 = vmax.xlane.f32.xlu1 %v2292_v49 }
0x19fb   :  { %2303 = vrot.lane.b32.xlu1 %v5529_v43, %s4935_s23 }
0x1a77   :  { %v2294_v51 = vpop.xlane.xlu1 %2293 }
0x1a78   :  { %v2295_v52 = vsub.f32 %v2291_v47, %v2294_v51 }
0x1a7a   :  { %v2296_v53 = vmul.f32 1.442695, %v2295_v52 }
0x1a7b   :  { %v2304_v21 = vpop.permute.xlu1 %2303 }
0x1a7c   :  { %4858 = vpow2.f32 %v2296_v53  ;;  %4488 = vmatpush3.msk.msra.mxu1 %vm184_vm2, %v2304_v21 }
0x1a7d   :  { %4492 = vmatprep.subr.mxu1 %v4931_v55 }
0x1a86   :  { %v4859_v54 = vpop.eup %4858 }
0x1a87   :  { %v2298_v17 = vsel %vm450_vm8, %v4859_v54, 0.0 }
0x1a88   :  { %2299 = vadd.xlane.f32.xlu1 %v2298_v17 }
0x1a99   :  { %2380 = vrot.lane.b32.xlu1 %v5529_v43, %s4936_s1 }
0x1a9d   :  { %2549 = vrot.lane.b32.xlu1 %v5529_v43, %s4939_s25 }
0x1aa1   :  { %2716 = vrot.lane.b32.xlu1 %v5529_v43, %s5893_s7 }
0x1b15   :  { %v2300_v56 = vpop.xlane.xlu1 %2299 }
0x1b16   :  { %4860 = vrcp.f32 %v2300_v56 }
0x1b19   :  { %v2381_v57 = vpop.permute.xlu1 %2380 }
0x1b1d   :  { %v5553_v59 = vpop.permute.xlu1 %2549 }
0x1b20   :  { %v4861_v61 = vpop.eup %4860 }
0x1b21   :  { %v2302_v62 = vmul.f32 %v4861_v61, %v4859_v54  ;;  %v2717_v63 = vpop.permute.xlu1 %2716 }
0x1b22   :  { %4513 = vmatpush3.xpose.msk.msra.mxu0 %vm374_vm7, %v2717_v63 }
0x1b23   :  { %4490 = vmatmul.mubr.msk.f32.vlgmr.msra.gmra.mrb[38].mxu1 %vm464_vm9, %v2302_v62  ;;  %4522 = vmatprep.subr.mxu0 %v4931_v55 }
0x1b24   :  { %4493 = vmatpush3.xpose.msk.msra.mxu1 %vm374_vm7, %v2383_v0  ;;  %4494 = vmatprep.mubr.msk.f32.mxu1 %vm4932_vm6, %v4931_v55 }
0x1b25   :  { %4497 = vmatprep.subr.mxu1 %v4931_v55 }
0x1b27   :  { %4495 = vmatmul.mubr.msk.f32.vlgmr.msra.gmra.mrb[40].mxu1 %vm374_vm7, %v2381_v57 }
0x1b28   :  { %4499 = vmatprep.mubr.msk.f32.mxu1 %vm4932_vm6, %v4931_v55 }
0x1bf6   :  { %v5565_v1 = vpop.f32.mrb[38].mxu1 }
0x1bf7   :  { %v4491_v2 = vpop.f32.mrb[39].mxu1 }
0x1bfa   :  { %v2454_v5 = vpop.f32.mrb[40].mxu1 }
0x1bfb   :  { %v2458_v58 = vmul.f32 0.35355338, %v2454_v5  ;;  %v4496_v8 = vpop.f32.mrb[41].mxu1 }
0x1bfd   :  { %v2459_v60 = vsel %vm450_vm8, %v2458_v58, -inf }
0x1bfe   :  { %2460 = vmax.xlane.f32.xlu0 %v2459_v60 }
0x1c14   :  { %2470 = vrot.lane.b32.xlu0 %v5529_v43, %s5894_s9 }
0x1c18   :  { %2547 = vrot.lane.b32.xlu0 %v5529_v43, %s5895_s4 }
0x1c1c   :  { %2714 = vrot.lane.b32.xlu0 %v5529_v43, %s5896_s30 }
0x1c20   :  { %3067 = vrot.lane.b32.xlu0 %v5576_v4, %s4934_s22  ;;  %s5898_s22 = smov 48  }
0x1c24   :  { %3234 = vrot.lane.b32.xlu0 %v5576_v4, %s4939_s25 }
0x1c28   :  { %3401 = vrot.lane.b32.xlu0 %v5576_v4, %s5893_s7 }
0x1c8b   :  { %v2461_v10 = vpop.xlane.xlu0 %2460 }
0x1c8c   :  { %v2462_v44 = vsub.f32 %v2458_v58, %v2461_v10 }
0x1c8e   :  { %v2463_v11 = vmul.f32 1.442695, %v2462_v44 }
0x1c8f   :  { %v2471_v12 = vpop.permute.xlu0 %2470 }
0x1c90   :  { %4862 = vpow2.f32 %v2463_v11  ;;  %4498 = vmatpush3.msk.msra.mxu1 %vm184_vm2, %v2471_v12 }
0x1c91   :  { %4502 = vmatprep.subr.mxu1 %v4931_v55 }
0x1c93   :  { %v2548_v45 = vpop.permute.xlu0 %2547 }
0x1c97   :  { %v2715_v13 = vpop.permute.xlu0 %2714 }
0x1c98   :  { %4515 = vmatmul.mubr.msk.f32.vlgmr.msra.gmra.mrb[8].mxu0 %vm374_vm7, %v2715_v13 }
0x1c99   :  { %4524 = vmatprep.mubr.msk.f32.mxu0 %vm4932_vm6, %v4931_v55 }
0x1c9a   :  { %v4863_v15 = vpop.eup %4862 }
0x1c9b   :  { %v2465_v16 = vsel %vm450_vm8, %v4863_v15, 0.0  ;;  %v3068_v19 = vpop.permute.xlu0 %3067 }
0x1c9c   :  { %2466 = vadd.xlane.f32.xlu1 %v2465_v16 }
0x1c9f   :  { %v3235_v23 = vpop.permute.xlu0 %3234 }
0x1ca3   :  { %v3402_v27 = vpop.permute.xlu0 %3401 }
0x1cad   :  { %2900 = vrot.lane.b32.xlu1 %v5576_v4, %s4933_s5  ;;  %s5897_s5 = smov 40  }
0x1cb1   :  { %3065 = vrot.lane.b32.xlu1 %v5576_v4, %s4936_s1 }
0x1cb5   :  { %3232 = vrot.lane.b32.xlu1 %v5576_v4, %s5895_s4 }
0x1cb9   :  { %3399 = vrot.lane.b32.xlu1 %v5576_v4, %s5896_s30 }
0x1d29   :  { %v2467_v18 = vpop.xlane.xlu1 %2466 }
0x1d2a   :  { %4864 = vrcp.f32 %v2467_v18 }
0x1d2d   :  { %v2901_v20 = vpop.permute.xlu1 %2900 }
0x1d2e   :  { %4523 = vmatpush3.xpose.msk.msra.mxu0 %vm374_vm7, %v2901_v20 }
0x1d2f   :  { %4532 = vmatprep.subr.mxu0 %v4931_v55 }
0x1d31   :  { %4525 = vmatmul.mubr.msk.f32.vlgmr.msra.gmra.mrb[10].mxu0 %vm374_vm7, %v5576_v4  ;;  %v3066_v22 = vpop.permute.xlu1 %3065 }
0x1d32   :  { %4533 = vmatpush3.xpose.msk.msra.mxu0 %vm374_vm7, %v3068_v19  ;;  %4534 = vmatprep.mubr.msk.f32.mxu0 %vm4932_vm6, %v4931_v55 }
0x1d33   :  { %4542 = vmatprep.subr.mxu0 %v4931_v55 }
0x1d34   :  { %v4865_v24 = vpop.eup %4864 }
0x1d35   :  { %v2469_v25 = vmul.f32 %v4865_v24, %v4863_v15  ;;  %4535 = vmatmul.mubr.msk.f32.vlgmr.msra.gmra.mrb[12].mxu0 %vm374_vm7, %v3066_v22  ;;  %v3233_v26 = vpop.permute.xlu1 %3232 }
0x1d36   :  { %4543 = vmatpush3.xpose.msk.msra.mxu0 %vm374_vm7, %v3235_v23  ;;  %4544 = vmatprep.mubr.msk.f32.mxu0 %vm4932_vm6, %v4931_v55 }
0x1d37   :  { %4500 = vmatmul.mubr.msk.f32.vlgmr.msra.gmra.mrb[42].mxu1 %vm464_vm9, %v2469_v25  ;;  %4552 = vmatprep.subr.mxu0 %v4931_v55 }
0x1d38   :  { %4503 = vmatpush3.xpose.msk.msra.mxu1 %vm374_vm7, %v5553_v59  ;;  %4504 = vmatprep.mubr.msk.f32.mxu1 %vm4932_vm6, %v4931_v55 }
0x1d39   :  { %4545 = vmatmul.mubr.msk.f32.vlgmr.msra.gmra.mrb[14].mxu0 %vm374_vm7, %v3233_v26  ;;  %4507 = vmatprep.subr.mxu1 %v4931_v55  ;;  %v3400_v28 = vpop.permute.xlu1 %3399 }
0x1d3a   :  { %4553 = vmatpush3.xpose.msk.msra.mxu0 %vm374_vm7, %v3402_v27  ;;  %4554 = vmatprep.mubr.msk.f32.mxu0 %vm4932_vm6, %v4931_v55 }
0x1d3b   :  { %4505 = vmatmul.mubr.msk.f32.vlgmr.msra.gmra.mrb[44].mxu1 %vm374_vm7, %v2548_v45 }
0x1d3c   :  { %4509 = vmatprep.mubr.msk.f32.mxu1 %vm4932_vm6, %v4931_v55 }
0x1d3d   :  { %4555 = vmatmul.mubr.msk.f32.vlgmr.msra.gmra.mrb[16].mxu0 %vm374_vm7, %v3400_v28 }
0x1d6b   :  { %v2788_v29 = vpop.f32.mrb[8].mxu0 }
0x1d6c   :  { %v2792_v30 = vmul.f32 0.35355338, %v2788_v29  ;;  %v4516_v31 = vpop.f32.mrb[9].mxu0 }
0x1d6e   :  { %v2793_v32 = vsel %vm450_vm8, %v2792_v30, -inf }
0x1d6f   :  { %2794 = vmax.xlane.f32.xlu1 %v2793_v32 }
0x1dfc   :  { %v2795_v34 = vpop.xlane.xlu1 %2794 }
0x1dfd   :  { %v2796_v35 = vsub.f32 %v2792_v30, %v2795_v34 }
0x1dff   :  { %v2797_v37 = vmul.f32 1.442695, %v2796_v35 }
0x1e01   :  { %4866 = vpow2.f32 %v2797_v37 }
0x1e04   :  { %v2972_v36 = vpop.f32.mrb[10].mxu0 }
0x1e05   :  { %v4526_v9 = vpop.f32.mrb[11].mxu0  ;;  %v2976_v51 = vmul.f32 0.35355338, %v2972_v36 }
0x1e07   :  { %v2977_v57 = vsel %vm450_vm8, %v2976_v51, -inf }
0x1e08   :  { %v3139_v38 = vpop.f32.mrb[12].mxu0 }
0x1e09   :  { %v4536_v39 = vpop.f32.mrb[13].mxu0  ;;  %v3143_v56 = vmul.f32 0.35355338, %v3139_v38 }
0x1e0a   :  { %v5626_v40 = vpop.f32.mrb[42].mxu1 }
0x1e0b   :  { %v4501_v41 = vpop.f32.mrb[43].mxu1  ;;  %v5630_v17 = vpop.eup %4866  ;;  %v3144_v62 = vsel %vm450_vm8, %v3143_v56, -inf }
0x1e0c   :  { %v3306_v42 = vpop.f32.mrb[14].mxu0  ;;  %v2799_v59 = vsel %vm450_vm8, %v5630_v17, 0.0 }
0x1e0d   :  { %v4546_v14 = vpop.f32.mrb[15].mxu0  ;;  %v3310_v61 = vmul.f32 0.35355338, %v3306_v42 }
0x1e0e   :  { %v2621_v46 = vpop.f32.mrb[44].mxu1 }
0x1e0f   :  { %v2625_v47 = vmul.f32 0.35355338, %v2621_v46  ;;  %v4506_v48 = vpop.f32.mrb[45].mxu1  ;;  %v3311_v63 = vsel %vm450_vm8, %v3310_v61, -inf }
0x1e10   :  { %v3473_v49 = vpop.f32.mrb[16].mxu0 }
0x1e11   :  { %v3477_v52 = vmul.f32 0.35355338, %v3473_v49  ;;  %v4556_v53 = vpop.f32.mrb[17].mxu0  ;;  %v2626_v21 = vsel %vm450_vm8, %v2625_v47, -inf }
0x1e12   :  { %2627 = vmax.xlane.f32.xlu0 %v2626_v21 }
0x1e13   :  { %v3478_v54 = vsel %vm450_vm8, %v3477_v52, -inf }
0x1e14   :  { %3479 = vmax.xlane.f32.xlu1 %v3478_v54 }
0x1e16   :  { %2978 = vmax.xlane.f32.xlu0 %v2977_v57 }
0x1e18   :  { %2800 = vadd.xlane.f32.xlu1 %v2799_v59 }
0x1e1a   :  { %3145 = vmax.xlane.f32.xlu0 %v3144_v62 }
0x1e1e   :  { %3312 = vmax.xlane.f32.xlu0 %v3311_v63  ;;  %v4146_v63 = vld [vmem:[%s5853_s10 + $0x30] sm:$0xff] }
0x1e9f   :  { %v2628_v0 = vpop.xlane.xlu0 %2627 }
0x1ea0   :  { %v2629_v10 = vsub.f32 %v2625_v47, %v2628_v0  ;;  %v4147_v0 = vld [vmem:[%s5853_s10 + $0x38] sm:$0xff] }
0x1ea1   :  { %v3480_v2 = vpop.xlane.xlu1 %3479 }
0x1ea2   :  { %v3481_v8 = vsub.f32 %v3477_v52, %v3480_v2  ;;  %v2630_v13 = vmul.f32 1.442695, %v2629_v10  ;;  %v4734_v2 = vpack.c.bf16 %v4147_v0, %v4146_v63 }
0x1ea3   :  { %v2979_v5 = vpop.xlane.xlu0 %2978 }
0x1ea4   :  { %v2980_v58 = vsub.f32 %v2976_v51, %v2979_v5  ;;  %v3482_v44 = vmul.f32 1.442695, %v3481_v8 }
0x1ea5   :  { %v2801_v29 = vpop.xlane.xlu1 %2800 }
0x1ea6   :  { %v2981_v60 = vmul.f32 1.442695, %v2980_v58 }
0x1ea7   :  { %v3146_v33 = vpop.xlane.xlu0 %3145 }
0x1ea8   :  { %4868 = vpow2.f32 %v2981_v60  ;;  %v3147_v50 = vsub.f32 %v3143_v56, %v3146_v33  ;;  %v4145_v56 = vld [vmem:[%s5853_s10 + $0x28] sm:$0xff] }
0x1eaa   :  { %v3148_v11 = vmul.f32 1.442695, %v3147_v50 }
0x1eab   :  { %v3313_v12 = vpop.xlane.xlu0 %3312 }
0x1eac   :  { %4870 = vpow2.f32 %v3148_v11  ;;  %v3314_v45 = vsub.f32 %v3310_v61, %v3313_v12 }
0x1ead   :  { %4872 = vpow2.f32 %v3482_v44 }
0x1eae   :  { %v3315_v15 = vmul.f32 1.442695, %v3314_v45 }
0x1eb0   :  { %4874 = vpow2.f32 %v3315_v15 }
0x1eb1   :  { %4876 = vpow2.f32 %v2630_v13 }
0x1eb2   :  { %v4869_v16 = vpop.eup %4868 }
0x1eb3   :  { %v2983_v18 = vsel %vm450_vm8, %v4869_v16, 0.0 }
0x1eb4   :  { %2984 = vadd.xlane.f32.xlu0 %v2983_v18 }
0x1eb6   :  { %v4871_v19 = vpop.eup %4870 }
0x1eb7   :  { %v3150_v20 = vsel %vm450_vm8, %v4871_v19, 0.0  ;;  %v5639_v22 = vpop.eup %4872 }
0x1eb8   :  { %3151 = vadd.xlane.f32.xlu1 %v3150_v20  ;;  %v3484_v25 = vsel %vm450_vm8, %v5639_v22, 0.0 }
0x1eba   :  { %v4875_v23 = vpop.eup %4874 }
0x1ebb   :  { %v3317_v24 = vsel %vm450_vm8, %v4875_v23, 0.0  ;;  %v4877_v26 = vpop.eup %4876 }
0x1ebc   :  { %3318 = vadd.xlane.f32.xlu0 %v3317_v24  ;;  %3485 = vadd.xlane.f32.xlu1 %v3484_v25  ;;  %v2632_v27 = vsel %vm450_vm8, %v4877_v26, 0.0  ;;  %v4148_v25 = vld [vmem:[%s5854_s11 + $0x1] ss:$0 sm:$0xff] }
0x1ec0   :  { %2633 = vadd.xlane.f32.xlu0 %v2632_v27 }
0x1ecd   :  { %2804 = vrot.lane.b32.xlu1 %v5529_v43, %s5897_s5 }
0x1ed1   :  { %2988 = vrot.lane.b32.xlu1 %v5576_v4, %s4935_s23 }
0x1ed5   :  { %3155 = vrot.lane.b32.xlu1 %v5576_v4, %s5894_s9 }
0x1ed6   :  { %2637 = vrot.lane.b32.xlu0 %v5529_v43, %s5898_s22 }
0x1ed9   :  { %3489 = vrot.lane.b32.xlu1 %v5576_v4, %s5897_s5 }
0x1eda   :  { %3322 = vrot.lane.b32.xlu0 %v5576_v4, %s5898_s22 }
0x1ede   :  { %2882 = vrot.lane.b32.xlu0 %v5626_v40, %s4944_s29 }
0x1f41   :  { %v2985_v28 = vpop.xlane.xlu0 %2984 }
0x1f45   :  { %v3152_v31 = vpop.xlane.xlu1 %3151 }
0x1f49   :  { %v3319_v30 = vpop.xlane.xlu0 %3318  ;;  %v3486_v34 = vpop.xlane.xlu1 %3485 }
0x1f4d   :  { %v2634_v32 = vpop.xlane.xlu0 %2633  ;;  %v2805_v43 = vpop.permute.xlu1 %2804 }
0x1f4e   :  { %4878 = vrcp.f32 %v2634_v32 }
0x1f4f   :  { %4880 = vrcp.f32 %v2801_v29 }
0x1f50   :  { %4882 = vrcp.f32 %v2985_v28 }
0x1f51   :  { %v2638_v35 = vpop.permute.xlu0 %2637  ;;  %4884 = vrcp.f32 %v3152_v31  ;;  %v2989_v38 = vpop.permute.xlu1 %2988 }
0x1f52   :  { %4508 = vmatpush3.msk.msra.mxu1 %vm184_vm2, %v2638_v35  ;;  %4886 = vrcp.f32 %v3319_v30 }
0x1f53   :  { %4517 = vmatprep.subr.mxu1 %v4931_v55  ;;  %4888 = vrcp.f32 %v3486_v34 }
0x1f55   :  { %v3156_v42 = vpop.permute.xlu1 %3155  ;;  %v3323_v47 = vpop.permute.xlu0 %3322 }
0x1f58   :  { %v4879_v36 = vpop.eup %4878 }
0x1f59   :  { %v2636_v4 = vmul.f32 %v4879_v36, %v4877_v26  ;;  %v4881_v9 = vpop.eup %4880  ;;  %v3490_v51 = vpop.permute.xlu1 %3489 }
0x1f5a   :  { %v2803_v37 = vmul.f32 %v4881_v9, %v5630_v17  ;;  %v4883_v39 = vpop.eup %4882  ;;  %v4144_v17 = vld [vmem:[%s5853_s10 + $0x20] sm:$0xff]  ;;  %v2883_v10 = vpop.permute.xlu0 %2882 }
0x1f5b   :  { %4510 = vmatmul.mubr.msk.f32.vlgmr.msra.gmra.mrb[46].mxu1 %vm464_vm9, %v2636_v4  ;;  %v2987_v40 = vmul.f32 %v4883_v39, %v4869_v16  ;;  %v4885_v41 = vpop.eup %4884  ;;  %v4730_v59 = vpack.c.bf16 %v4145_v56, %v4144_v17  ;;  %v2893_v18 = vsel %vm374_vm7, %v5565_v1, %v2883_v10  ;;  %v4153_v39 = vld [vmem:[%s5857_s14 + $0x20] sm:$0xff] }
0x1f5c   :  { %4518 = vmatpush3.msk.msra.mxu1 %vm184_vm2, %v2805_v43  ;;  %4519 = vmatprep.mubr.msk.f32.mxu1 %vm4932_vm6, %v4931_v55  ;;  %v3154_v14 = vmul.f32 %v4885_v41, %v4871_v19  ;;  %v4887_v46 = vpop.eup %4886  ;;  %v4152_v56 = vld [vmem:[%s5856_s13 + $0x1] ss:$0 sm:$0xff] }
0x1f5d   :  { %4527 = vmatprep.subr.mxu1 %v4931_v55  ;;  %v3321_v48 = vmul.f32 %v4887_v46, %v4875_v23  ;;  %v4889_v49 = vpop.eup %4888  ;;  %4731 = vmatprep.subr.bf16.mxu0 %v4730_v59 }
0x1f5e   :  { %v3488_v52 = vmul.f32 %v4889_v49, %v5639_v22  ;;  %4733 = vmatpush3.bf16.msra.mxu0 %v4730_v59 }
0x1f5f   :  { %4520 = vmatmul.mubr.msk.f32.vlgmr.msra.gmra.mrb[48].mxu1 %vm464_vm9, %v2803_v37  ;;  %4735 = vmatprep.subr.bf16.mxu0 %v4734_v2 }
0x1f60   :  { %4528 = vmatpush3.msk.msra.mxu1 %vm184_vm2, %v2989_v38  ;;  %4529 = vmatprep.mubr.msk.f32.mxu1 %vm4932_vm6, %v4931_v55 }
0x1f61   :  { %4537 = vmatprep.subr.mxu1 %v4931_v55 }
0x1f62   :  { %4737 = vmatpush3.bf16.msra.mxu0 %v4734_v2  ;;  %v4162_v2 = vld [vmem:[%s5859_s16 + $0x80] sm:$0xff] }
0x1f63   :  { %4530 = vmatmul.mubr.msk.f32.vlgmr.msra.gmra.mrb[50].mxu1 %vm464_vm9, %v2987_v40  ;;  %v4154_v40 = vld [vmem:[%s5857_s14 + $0x28] sm:$0xff] }
0x1f64   :  { %4538 = vmatpush3.msk.msra.mxu1 %vm184_vm2, %v3156_v42  ;;  %4539 = vmatprep.mubr.msk.f32.mxu1 %vm4932_vm6, %v4931_v55  ;;  %v4738_v41 = vpack.c.bf16 %v4154_v40, %v4153_v39  ;;  %v4155_v42 = vld [vmem:[%s5857_s14 + $0x30] sm:$0xff]  ;;  %v4178_v40 = vld [vmem:[%s5860_s17 + $0x1] ss:$0 sm:$0xff] }
0x1f65   :  { %4547 = vmatprep.subr.mxu1 %v4931_v55 }
0x1f67   :  { %4540 = vmatmul.mubr.msk.f32.vlgmr.msra.gmra.mrb[52].mxu1 %vm464_vm9, %v3154_v14  ;;  %v4156_v14 = vld [vmem:[%s5857_s14 + $0x38] sm:$0xff] }
0x1f68   :  { %4548 = vmatpush3.msk.msra.mxu1 %vm184_vm2, %v3323_v47  ;;  %4549 = vmatprep.mubr.msk.f32.mxu1 %vm4932_vm6, %v4931_v55  ;;  %v4742_v46 = vpack.c.bf16 %v4156_v14, %v4155_v42 }
0x1f69   :  { %4557 = vmatprep.subr.mxu1 %v4931_v55 }
0x1f6b   :  { %4550 = vmatmul.mubr.msk.f32.vlgmr.msra.gmra.mrb[54].mxu1 %vm464_vm9, %v3321_v48 }
0x1f6c   :  { %4558 = vmatpush3.msk.msra.mxu1 %vm184_vm2, %v3490_v51  ;;  %4559 = vmatprep.mubr.msk.f32.mxu1 %vm4932_vm6, %v4931_v55 }
0x1f6d   :  { %4739 = vmatprep.subr.bf16.mxu1 %v4738_v41 }
0x1f6f   :  { %4560 = vmatmul.mubr.msk.f32.vlgmr.msra.gmra.mrb[56].mxu1 %vm464_vm9, %v3488_v52 }
0x1f70   :  { %4741 = vmatpush3.bf16.msra.mxu1 %v4738_v41 }
0x1f71   :  { %4743 = vmatprep.subr.bf16.mxu1 %v4742_v46 }
0x1f74   :  { %4745 = vmatpush3.bf16.msra.mxu1 %v4742_v46 }
0x1f75   :  { %4778 = vmatprep.subr.bf16.mxu1 %v4930_v3 }
0x202e   :  { %v2710_v53 = vpop.f32.mrb[46].mxu1 }
0x202f   :  { %v4511_v21 = vpop.f32.mrb[47].mxu1 }
0x2032   :  { %v2877_v54 = vpop.f32.mrb[48].mxu1 }
0x2033   :  { %v4521_v57 = vpop.f32.mrb[49].mxu1 }
0x2036   :  { %v3061_v61 = vpop.f32.mrb[50].mxu1 }
0x2037   :  { %v4531_v62 = vpop.f32.mrb[51].mxu1 }
0x203a   :  { %v3228_v5 = vpop.f32.mrb[52].mxu1 }
0x203b   :  { %3567 = vrot.lane.b32.xlu0 %v3228_v5, %s4944_s29  ;;  %v4541_v58 = vpop.f32.mrb[53].mxu1  ;;  %v4163_v5 = vld [vmem:[%s5859_s16 + $0x88] sm:$0xff] }
0x203c   :  { %v4746_v58 = vpack.c.bf16 %v4163_v5, %v4162_v2  ;;  %v4179_v5 = vld [vmem:[%s5861_s18] ss:$0 sm:$0xff] }
0x203e   :  { %v3395_v8 = vpop.f32.mrb[54].mxu1  ;;  %4747 = vmatprep.subr.bf16.mxu0 %v4746_v58 }
0x203f   :  { %2886 = vrot.lane.b32.xlu0 %v2710_v53, %s4945_s0  ;;  %3571 = vrot.lane.b32.xlu1 %v3395_v8, %s4945_s0  ;;  %v4551_v60 = vpop.f32.mrb[55].mxu1  ;;  %v4164_v8 = vld [vmem:[%s5859_s16 + $0x90] sm:$0xff] }
0x2040   :  { %v4165_v60 = vld [vmem:[%s5859_s16 + $0x98] sm:$0xff] }
0x2042   :  { %v3562_v33 = vpop.f32.mrb[56].mxu1 }
0x2043   :  { %3575 = vrot.lane.b32.xlu1 %v3562_v33, %s5899_s28  ;;  %v4561_v50 = vpop.f32.mrb[57].mxu1  ;;  %v4166_v33 = vld [vmem:[%s5859_s16 + $0xa0] sm:$0xff] }
0x2044   :  { %v4167_v50 = vld [vmem:[%s5859_s16 + $0xa8] sm:$0xff] }
0x2045   :  { %v4754_v10 = vpack.c.bf16 %v4167_v50, %v4166_v33 }
0x2047   :  { %2890 = vrot.lane.b32.xlu1 %v2877_v54, %s5899_s28  ;;  %v4151_v54 = vld [vmem:[%s5855_s12 + $0x1] ss:$0 sm:$0xff] }
0x20ad   :  { %v3568_v44 = vpop.permute.xlu0 %3567 }
0x20ae   :  { %v3578_v12 = vsel %vm374_vm7, %v3061_v61, %v3568_v44  ;;  %v4168_v44 = vld [vmem:[%s5859_s16 + $0xb0] sm:$0xff] }
0x20b1   :  { %v3572_v11 = vpop.permute.xlu1 %3571  ;;  %v2887_v15 = vpop.permute.xlu0 %2886 }
0x20b2   :  { %v3579_v45 = vsel %vm1054_vm12, %v3578_v12, %v3572_v11  ;;  %v2894_v19 = vsel %vm1054_vm12, %v2893_v18, %v2887_v15  ;;  %v4169_v11 = vld [vmem:[%s5859_s16 + $0xb8] sm:$0xff] }
0x20b3   :  { %v4758_v12 = vpack.c.bf16 %v4169_v11, %v4168_v44  ;;  %v4173_v18 = vld [vmem:[%s5859_s16 + $0xd8] sm:$0xff] }
0x20b5   :  { %v3576_v13 = vpop.permute.xlu1 %3575 }
0x20b6   :  { %v3580_v16 = vsel %vm1056_vm11, %v3579_v45, %v3576_v13  ;;  %v4170_v45 = vld [vmem:[%s5859_s16 + $0xc0] sm:$0xff]  ;;  %v4171_v13 = vld [vmem:[%s5859_s16 + $0xc8] sm:$0xff] }
0x20b7   :  { %v3582_v20 = vrot.slane %v3580_v16, 3  ;;  %v4762_v15 = vpack.c.bf16 %v4171_v13, %v4170_v45  ;;  %v4172_v16 = vld [vmem:[%s5859_s16 + $0xd0] sm:$0xff] }
0x20b9   :  { %v2891_v22 = vpop.permute.xlu1 %2890 }
0x20ba   :  { %v2895_v23 = vsel %vm1056_vm11, %v2894_v19, %v2891_v22  ;;  %v4766_v19 = vpack.c.bf16 %v4173_v18, %v4172_v16  ;;  %v4175_v22 = vld [vmem:[%s5859_s16 + $0xe8] sm:$0xff] }
0x20bb   :  { %v3584_v24 = vsel %vm184_vm2, %v2895_v23, %v3582_v20 }
0x20bc   :  { %4570 = vmatprep.mubr.msk.f32.mxu0 %vm196_vm4, %v3584_v24  ;;  %v4176_v24 = vld [vmem:[%s5859_s16 + $0xf0] sm:$0xff] }
0x20bd   :  { %4571 = vmatmul.mubr.msk.f32.vlgmr.msra.gmra.mrb[18].mxu0 %vm196_vm4, %v3582_v20  ;;  %v4174_v20 = vld [vmem:[%s5859_s16 + $0xe0] sm:$0xff] }
0x20be   :  { %4749 = vmatpush3.bf16.msra.mxu0 %v4746_v58  ;;  %v4770_v23 = vpack.c.bf16 %v4175_v22, %v4174_v20  ;;  %v4180_v58 = vld [vmem:[%s5862_s19] ss:$0 sm:$0xff] }
0x2190   :  { %v4572_v26 = vpop.f32.mrb[18].mxu0 }
0x2191   :  { %v3672_v27 = vadd.f32 %v4572_v26, %v4148_v25  ;;  %v3666_v28 = vpop.f32.mrb[19].mxu0 }
0x2192   :  { %v3667_v1 = vadd.f32 %v4148_v25, %v3666_v28  ;;  %v4177_v25 = vld [vmem:[%s5859_s16 + $0xf8] sm:$0xff] }
0x2193   :  { %v3676_v29 = vadd.f32 %v3672_v27, %v5490_v6  ;;  %v4774_v26 = vpack.c.bf16 %v4177_v25, %v4176_v24  ;;  %v4157_v27 = vld [vmem:[%s5858_s15 + $0x1] ss:$0 sm:$0xff] }
0x2194   :  { %v5720_v30 = vadd.f32 %v3667_v1, %v5493_v7 }
0x2195   :  { %v3682_v31 = vsel %vm200_vm5, %v3676_v29, 0.0 }
0x2196   :  { %3683 = vadd.xlane.f32.xlu1 %v3682_v31  ;;  %v3679_v32 = vsel %vm196_vm4, %v5720_v30, 0.0 }
0x2197   :  { %3680 = vadd.xlane.f32.xlu0 %v3679_v32 }
0x2223   :  { %v3684_v34 = vpop.xlane.xlu1 %3683 }
0x2224   :  { %v3686_v35 = vmul.f32 0.03125, %v3684_v34  ;;  %v3681_v43 = vpop.xlane.xlu0 %3680 }
0x2225   :  { %v3685_v36 = vmul.f32 0.03125, %v3681_v43 }
0x2226   :  { %v3688_v4 = vsub.f32 %v3676_v29, %v3686_v35 }
0x2227   :  { %v3687_v9 = vsub.f32 %v5720_v30, %v3685_v36 }
0x2228   :  { %v3690_v38 = vmul.f32 %v3688_v4, %v3688_v4 }
0x2229   :  { %v3689_v37 = vmul.f32 %v3687_v9, %v3687_v9 }
0x222a   :  { %v3694_v7 = vsel %vm200_vm5, %v3690_v38, 0.0 }
0x222b   :  { %v3691_v6 = vsel %vm196_vm4, %v3689_v37, 0.0 }
0x222c   :  { %3692 = vadd.xlane.f32.xlu0 %v3691_v6 }
0x2230   :  { %3695 = vadd.xlane.f32.xlu0 %v3694_v7 }
0x22b9   :  { %v3693_v47 = vpop.xlane.xlu0 %3692 }
0x22ba   :  { %v3697_v48 = vmul.f32 0.03125, %v3693_v47 }
0x22bc   :  { %v3699_v49 = vadd.f32 1e-05, %v3697_v48 }
0x22bd   :  { %v3696_v51 = vpop.xlane.xlu0 %3695 }
0x22be   :  { %4890 = vrsqrt.f32 %v3699_v49  ;;  %v3698_v52 = vmul.f32 0.03125, %v3696_v51 }
0x22c0   :  { %v3700_v53 = vadd.f32 1e-05, %v3698_v52 }
0x22c2   :  { %4892 = vrsqrt.f32 %v3700_v53 }
0x22c8   :  { %v4891_v21 = vpop.eup %4890 }
0x22c9   :  { %v3703_v17 = vmul.f32 %v4891_v21, %v3687_v9 }
0x22cb   :  { %v3709_v57 = vmul.f32 %v4151_v54, %v3703_v17  ;;  %v3954_v17 = vld [vmem:[%s5863_s20] sm:$0xff] }
0x22cc   :  { %v4893_v59 = vpop.eup %4892 }
0x22cd   :  { %v3704_v61 = vmul.f32 %v4893_v59, %v3688_v4  ;;  %v3715_v62 = vadd.f32 %v4152_v56, %v3709_v57  ;;  %v3956_v57 = vld [vmem:[%s5863_s20 + $0x10] sm:$0xff]  ;;  %v3957_v59 = vld [vmem:[%s5863_s20 + $0x18] sm:$0xff] }
0x22cf   :  { %v3710_v63 = vmul.f32 %v4151_v54, %v3704_v61  ;;  %4581 = vmatprep.mubr.msk.f32.mxu1 %vm196_vm4, %v3715_v62  ;;  %v4782_v61 = vpack.c.bf16 %v3957_v59, %v3956_v57 }
0x22d1   :  { %v3716_v0 = vadd.f32 %v4152_v56, %v3710_v63 }
0x22d3   :  { %4582 = vmatmul.mubr.msk.f32.vlgmr.msra.gmra.mrb[58].mxu1 %vm196_vm4, %v3716_v0 }
0x22d4   :  { %4627 = vmatprep.mubr.msk.f32.mxu1 %vm4932_vm6, %v4931_v55  ;;  %v4750_v55 = vpack.c.bf16 %v4165_v60, %v4164_v8 }
0x22d6   :  { %4751 = vmatprep.subr.bf16.mxu0 %v4750_v55 }
0x22d7   :  { %4753 = vmatpush3.bf16.msra.mxu0 %v4750_v55 }
0x22d8   :  { %4755 = vmatprep.subr.bf16.mxu0 %v4754_v10 }
0x22db   :  { %4757 = vmatpush3.bf16.msra.mxu0 %v4754_v10 }
0x22dc   :  { %4759 = vmatprep.subr.bf16.mxu0 %v4758_v12 }
0x22df   :  { %4761 = vmatpush3.bf16.msra.mxu0 %v4758_v12 }
0x22e0   :  { %4763 = vmatprep.subr.bf16.mxu0 %v4762_v15 }
0x22e3   :  { %4765 = vmatpush3.bf16.msra.mxu0 %v4762_v15 }
0x22e4   :  { %4767 = vmatprep.subr.bf16.mxu0 %v4766_v19 }
0x22e7   :  { %4769 = vmatpush3.bf16.msra.mxu0 %v4766_v19 }
0x22e8   :  { %4771 = vmatprep.subr.bf16.mxu0 %v4770_v23 }
0x22eb   :  { %4773 = vmatpush3.bf16.msra.mxu0 %v4770_v23 }
0x22ec   :  { %4775 = vmatprep.subr.bf16.mxu0 %v4774_v26 }
0x22ef   :  { %4777 = vmatpush3.bf16.msra.mxu0 %v4774_v26 }
0x23a6   :  { %v4583_v28 = vpop.f32.mrb[58].mxu1 }
0x23a7   :  { %v3805_v1 = vadd.f32 %v4583_v28, %v4157_v27  ;;  %v3799_v29 = vpop.f32.mrb[59].mxu1 }
0x23a8   :  { %v3800_v31 = vadd.f32 %v4157_v27, %v3799_v29 }
0x23a9   :  { %v4161_v32 = vmul.f32 -1.702, %v3805_v1 }
0x23aa   :  { %v4160_v34 = vmul.f32 -1.702, %v3800_v31 }
0x23ab   :  { %v3814_v35 = vmul.f32 1.442695, %v4161_v32 }
0x23ac   :  { %v3812_v43 = vmul.f32 1.442695, %v4160_v34 }
0x23ad   :  { %4894 = vpow2.f32 %v3814_v35 }
0x23ae   :  { %4896 = vpow2.f32 %v3812_v43 }
0x23b7   :  { %v4895_v36 = vpop.eup %4894 }
0x23b8   :  { %v4897_v4 = vpop.eup %4896  ;;  %v3817_v9 = vadd.f32 1.0, %v4895_v36 }
0x23b9   :  { %v3816_v37 = vadd.f32 1.0, %v4897_v4 }
0x23ba   :  { %4898 = vrcp.f32 %v3817_v9 }
0x23bb   :  { %4900 = vrcp.f32 %v3816_v37 }
0x23c4   :  { %v4899_v6 = vpop.eup %4898 }
0x23c5   :  { %v4901_v38 = vpop.eup %4900  ;;  %v3823_v39 = vmul.f32 %v4899_v6, %v3805_v1 }
0x23c6   :  { %v3822_v7 = vmul.f32 %v4901_v38, %v3800_v31 }
0x23c8   :  { %4616 = vmatprep.mubr.f32.mxu0 %v3822_v7 }
0x23c9   :  { %4617 = vmatmul.mubr.f32.vlgmr.msra.gmra.mrb[20].mxu0 %v3823_v39 }
0x249c   :  { %v4618_v41 = vpop.f32.mrb[20].mxu0 }
0x249d   :  { %v3912_v42 = vpop.f32.mrb[21].mxu0 }
0x249e   :  { %v3913_v14 = vadd.f32 %v4178_v40, %v3912_v42 }
0x24a0   :  { %v3920_v46 = vadd.f32 %v3913_v14, %v5720_v30  ;;  %v3955_v30 = vld [vmem:[%s5863_s20 + $0x8] sm:$0xff]  ;;  %s4947_s20 = smov [#allocation2]  }
0x24a1   :  { %v4779_v56 = vpack.c.bf16 %v3955_v30, %v3954_v17  ;;  %s4044_s22 = sshll.u32 %s4947_s20, 4  ;;  %s4045_s22 = int_to_ptr.vmem [resolvable:$true] %s4044_s22 }
0x24a2   :  { %v3922_v47 = vrot.slane %v3920_v46, 4  ;;  %s4906_s18 = scalar_lea.vmem %s4045_s22, 32  ;;  %p4911_p1 = scmp.lt.s32.totalorder %s4045_s22, %s4045_s22 }
0x24a3   :  { %4780 = vmatpush3.bf16.msra.mxu1 %v4779_v56  ;;  %p4907_p0 = scmp.ne.s32.totalorder %s4045_s22, %s4906_s18  ;;  %p4912_p2 = scmp.lt.s32.totalorder %s4906_s18, %s4906_s18 }
0x24a4   :  { %v3924_v48 = vsel %vm182_vm1, %v3920_v46, %v3922_v47  ;;  %4781 = vmatprep.subr.bf16.mxu1 %v4930_v3 }
0x24a5   :  { %v3927_v49 = vsel %vm200_vm5, %v3924_v48, 0.0  ;;  %p4913_p3 = por %p4912_p2, %p4911_p1 }
0x24a6   :  { %3928 = vadd.xlane.f32.xlu0 %v3927_v49 }
0x24a7   :  { %4783 = vmatpush3.bf16.msra.mxu1 %v4782_v61  ;;  %p4914_p4 = pnand %p4913_p3, %p4907_p0 }
0x2533   :  { %v3929_v51 = vpop.xlane.xlu0 %3928 }
0x2534   :  { %v3930_v52 = vmul.f32 0.03125, %v3929_v51 }
0x2536   :  { %v3931_v53 = vsub.f32 %v3924_v48, %v3930_v52 }
0x2538   :  { %v3932_v21 = vmul.f32 %v3931_v53, %v3931_v53 }
0x253a   :  { %v3933_v54 = vsel %vm200_vm5, %v3932_v21, 0.0 }
0x253b   :  { %3934 = vadd.xlane.f32.xlu1 %v3933_v54 }
0x25c8   :  { %v3935_v62 = vpop.xlane.xlu1 %3934 }
0x25c9   :  { %v3936_v63 = vmul.f32 0.03125, %v3935_v62 }
0x25cb   :  { %v3937_v0 = vadd.f32 1e-05, %v3936_v63 }
0x25cd   :  { %4902 = vrsqrt.f32 %v3937_v0 }
0x25d7   :  { %v4903_v2 = vpop.eup %4902 }
0x25d8   :  { %v3939_v3 = vmul.f32 %v4903_v2, %v3931_v53 }
0x25da   :  { %v3946_v8 = vmul.f32 %v4179_v5, %v3939_v3 }
0x25dc   :  { %v3953_v60 = vadd.f32 %v4180_v58, %v3946_v8 }
0x25de   :  { %4628 = vmatmul.mubr.msk.f32.vlgmr.msra.gmra.mrb[60].mxu1 %vm196_vm4, %v3953_v60 }
0x26b1   :  { %v4027_v55 = vpop.f32.mrb[60].mxu1 }
0x26b2   :  { %v4031_v33 = vmul.f32 %v4027_v55, %v4027_v55  ;;  %v4629_v50 = vpop.f32.mrb[61].mxu1 }
0x26b4   :  { %v4032_v10 = vsel %vm200_vm5, %v4031_v33, 0.0 }
0x26b5   :  { %4033 = vadd.xlane.f32.xlu0 %v4032_v10 }
0x2742   :  { %v4034_v44 = vpop.xlane.xlu0 %4033 }
0x2743   :  { %4904 = vrsqrt.f32 %v4034_v44 }
0x274d   :  { %v4905_v11 = vpop.eup %4904 }
0x274e   :  { %v4036_v12 = vmul.f32 %v4905_v11, %v4027_v55 }
0x2750   :  { %4037 = vst.msk [vmem:[#allocation2] sm:$0x3] %vm200_vm5, %v4036_v12 }
0x2751   :  { %4917 = shalt.err (!%p4914_p4)
}
0x2752   :  { %s4918_s23 = scalar_lea.hbm %s5864_s21, 32 }
0x2753   :  { %p4919_p5 = scmp.ne.s32.totalorder %s5864_s21, %s4918_s23  ;;  %p4922_p6 = scmp.lt.u32.totalorder %s4918_s23, %s5864_s21 }
0x2755   :  { %p4924_p7 = pnand %p4922_p6, %p4919_p5 }
0x2757   :  { %4927 = shalt.err (!%p4924_p7)
}
0x2758   :  { %4047 = dma.vmem_to_hbm [thread:$0]  %s4045_s22, 32, %s5864_s21, [#allocation3]  }
0x2759   :  { %4928 = dma.done.wait [#allocation3], 32  }
0x275a   :  { %4929 = vsyncadd [#allocation3], 4294967264 }
0x275b   :  { %4051 = vsyncpa [#allocation3], 1 }

</bundles_post_ra>
